<compile_context>
chip_gen: v6e
topology: v6e:2x2x1
jax: 0.10.0
libtpu: 0.0.40
codegen_flags: <defaults>
</compile_context>

<pallas_src>
import functools

import jax
import jax.numpy as jnp
from jax.experimental import pallas as pl
from jax.experimental.pallas import tpu as pltpu


# ---------------------------------------------------------------------------
# Pallas kernel: the ENTIRE encoder (all layers) in one invocation.
# ---------------------------------------------------------------------------
def encoder_kernel(
    x_ref,                                   # (B*L, H)
    wqkv_ref, bqkv_ref,                      # (nl, H, 3H), (nl, 1, 3H)
    wo_ref, bo_ref,                          # (nl, H, H),  (nl, 1, H)
    g1_ref, be1_ref,                         # (nl, 1, H)
    w1_ref, b1_ref,                          # (nl, H, 2H), (nl, 1, 2H)
    w2_ref, b2_ref,                          # (nl, 2H, H), (nl, 1, H)
    g2_ref, be2_ref,                         # (nl, 1, H)
    o_ref,                                   # (B*L, H)
    *, num_layers, num_heads, batch, seq_len,
):
    x = x_ref[...].astype(jnp.float32)       # (B*L, H)
    H = x.shape[1]
    L = seq_len
    nh = num_heads
    hd = H // nh
    scale = jnp.float32(1.0 / (hd ** 0.5))

    for layer in range(num_layers):          # static unroll over layers
        wqkv = wqkv_ref[layer]
        bqkv = bqkv_ref[layer]
        wo, bo = wo_ref[layer], bo_ref[layer]
        g1, be1 = g1_ref[layer], be1_ref[layer]
        w1, b1 = w1_ref[layer], b1_ref[layer]
        w2, b2 = w2_ref[layer], b2_ref[layer]
        g2, be2 = g2_ref[layer], be2_ref[layer]

        # ---- fused Q/K/V projection over all B*L rows ----
        qkv = jnp.dot(x, wqkv, preferred_element_type=jnp.float32) + bqkv  # (B*L, 3H)

        # ---- multi-head attention (dense softmax), output proj folded in ----
        att_blocks = []
        for b in range(batch):               # static unroll, batch is small
            r0 = b * L
            acc = jnp.zeros((L, H), jnp.float32)
            for h in range(nh):              # static unroll over heads
                c = h * hd
                q_h = qkv[r0:r0 + L, c:c + hd]                  # (L, hd)
                k_h = qkv[r0:r0 + L, H + c:H + c + hd]          # (L, hd)
                v_h = qkv[r0:r0 + L, 2 * H + c:2 * H + c + hd]  # (L, hd)

                # scores (L, L): contract head dims, no explicit transpose
                s = jax.lax.dot_general(
                    q_h, k_h, (((1,), (1,)), ((), ())),
                    preferred_element_type=jnp.float32) * scale
                s = s - jnp.max(s, axis=-1, keepdims=True)
                p = jnp.exp(s)
                p = p * pl.reciprocal(jnp.sum(p, axis=-1, keepdims=True),
                                      approx=True)

                o_h = jnp.dot(p, v_h, preferred_element_type=jnp.float32)  # (L, hd)
                # fold the output projection for this head's rows of Wo
                acc = acc + jnp.dot(o_h, wo[c:c + hd, :],
                                    preferred_element_type=jnp.float32)
            att_blocks.append(acc)
        att = jnp.concatenate(att_blocks, axis=0) + bo          # (B*L, H)

        # ---- residual + LayerNorm 1 ----
        xr = x + att
        mu = jnp.mean(xr, axis=-1, keepdims=True)
        var = jnp.mean((xr - mu) ** 2, axis=-1, keepdims=True)
        xn = (xr - mu) * jax.lax.rsqrt(var + 1e-5) * g1 + be1

        # ---- feed-forward: conv1(1x1) -> ReLU -> conv2(1x1) ----
        y = jnp.dot(xn, w1, preferred_element_type=jnp.float32) + b1
        y = jnp.maximum(y, 0.0)
        y = jnp.dot(y, w2, preferred_element_type=jnp.float32) + b2

        # ---- residual + LayerNorm 2 ----
        z = xn + y
        mu2 = jnp.mean(z, axis=-1, keepdims=True)
        var2 = jnp.mean((z - mu2) ** 2, axis=-1, keepdims=True)
        x = (z - mu2) * jax.lax.rsqrt(var2 + 1e-5) * g2 + be2

    o_ref[...] = x.astype(o_ref.dtype)


# ---------------------------------------------------------------------------
# Wrapper: one pallas_call for the whole encoder (no grid, everything in VMEM).
# ---------------------------------------------------------------------------
def encoder_forward(x, params, num_heads):
    B, L, H = x.shape
    num_layers = params["wqkv"].shape[0]
    x2 = x.reshape(B * L, H)

    names = ("wqkv", "bqkv", "wo", "bo", "g1", "be1",
             "w1", "b1", "w2", "b2", "g2", "be2")
    args = [params[k] for k in names]

    out2 = pl.pallas_call(
        functools.partial(
            encoder_kernel,
            num_layers=num_layers, num_heads=num_heads, batch=B, seq_len=L),
        out_shape=jax.ShapeDtypeStruct((B * L, H), jnp.float32),
        compiler_params=pltpu.CompilerParams(vmem_limit_bytes=64 * 1024 * 1024),
    )(x2, *args)
    return out2.reshape(B, L, H)


# ---------------------------------------------------------------------------
# Pure-JAX reference (same semantics) for a correctness check.
# ---------------------------------------------------------------------------
def _layer_norm(x, gamma, beta):
    mu = jnp.mean(x, axis=-1, keepdims=True)
    var = jnp.mean((x - mu) ** 2, axis=-1, keepdims=True)
    return (x - mu) * jax.lax.rsqrt(var + 1e-5) * gamma + beta


def encoder_reference(x, params, num_heads):
    B, L, H = x.shape
    nh, hd = num_heads, H // num_heads
    nl = params["wqkv"].shape[0]
    h = x
    for i in range(nl):
        qkv = h.reshape(B * L, H) @ params["wqkv"][i] + params["bqkv"][i]
        qkv = qkv.reshape(B, L, 3 * H)
        q, k, v = qkv[..., :H], qkv[..., H:2 * H], qkv[..., 2 * H:]
        q = q.reshape(B, L, nh, hd).transpose(0, 2, 1, 3)
        k = k.reshape(B, L, nh, hd).transpose(0, 2, 1, 3)
        v = v.reshape(B, L, nh, hd).transpose(0, 2, 1, 3)
        s = jnp.einsum("bhqd,bhkd->bhqk", q, k) / jnp.sqrt(jnp.float32(hd))
        p = jax.nn.softmax(s, axis=-1)
        o = jnp.einsum("bhqk,bhkd->bhqd", p, v).transpose(0, 2, 1, 3)
        att = o.reshape(B * L, H) @ params["wo"][i] + params["bo"][i]
        xr = h + att.reshape(B, L, H)
        xn = _layer_norm(xr, params["g1"][i], params["be1"][i])
        y = jnp.maximum(xn.reshape(B * L, H) @ params["w1"][i] + params["b1"][i], 0.0)
        y = (y @ params["w2"][i] + params["b2"][i]).reshape(B, L, H)
        h = _layer_norm(xn + y, params["g2"][i], params["be2"][i])
    return h


# ---------------------------------------------------------------------------
# Deterministic parameter init: per-layer weights stacked on a leading axis.
# ---------------------------------------------------------------------------
def init_params(key, num_layers, hidden_dim):
    H = hidden_dim
    layer_keys = jax.random.split(key, num_layers)

    def one(k):
        ks = jax.random.split(k, 12)
        nrm = lambda kk, shape: (0.05 * jax.random.normal(kk, shape)).astype(jnp.float32)
        wq, wk, wv = nrm(ks[0], (H, H)), nrm(ks[1], (H, H)), nrm(ks[2], (H, H))
        bq, bk, bv = nrm(ks[3], (1, H)), nrm(ks[4], (1, H)), nrm(ks[5], (1, H))
        return {
            # fused QKV projection, stored pre-transposed (in, out)
            "wqkv": jnp.concatenate([wq, wk, wv], axis=1),   # (H, 3H)
            "bqkv": jnp.concatenate([bq, bk, bv], axis=1),   # (1, 3H)
            "wo": nrm(ks[6], (H, H)), "bo": nrm(ks[7], (1, H)),
            "g1": jnp.ones((1, H), jnp.float32), "be1": jnp.zeros((1, H), jnp.float32),
            # conv1: Conv1d(H, 2H, k=1) == linear H->2H
            "w1": nrm(ks[8], (H, 2 * H)), "b1": nrm(ks[9], (1, 2 * H)),
            # conv2: Conv1d(2H, H, k=1) == linear 2H->H
            "w2": nrm(ks[10], (2 * H, H)), "b2": nrm(ks[11], (1, H)),
            "g2": jnp.ones((1, H), jnp.float32), "be2": jnp.zeros((1, H), jnp.float32),
        }

    per_layer = [one(k) for k in layer_keys]
    return {k: jnp.stack([p[k] for p in per_layer], axis=0) for k in per_layer[0]}


if __name__ == "__main__":
    num_layers = 2
    num_heads = 4
    hidden_dim = 32
    B, L = 2, 8

    root = jax.random.PRNGKey(0)
    x_key, p_key = jax.random.split(root)

    x = jax.random.normal(x_key, (B, L, hidden_dim), dtype=jnp.float32)
    params = init_params(p_key, num_layers, hidden_dim)

    out = encoder_forward(x, params, num_heads)
    out = jax.block_until_ready(out)

    assert out.shape == (B, L, hidden_dim)
    assert bool(jnp.all(jnp.isfinite(out)))

    ref = jax.block_until_ready(encoder_reference(x, params, num_heads))
    max_diff = float(jnp.max(jnp.abs(out - ref)))
    assert max_diff < 1e-2, f"kernel/reference mismatch: {max_diff}"

    print("KERNEL_OK")
</pallas_src>

<mosaic_0001>
module attributes {stable_mosaic.version = 11 : i64} {
  func.func @encoder_kernel(%arg0: memref<16x32xf32, #tpu.memory_space<vmem>>, %arg1: memref<2x32x96xf32, #tpu.memory_space<vmem>>, %arg2: memref<2x1x96xf32, #tpu.memory_space<vmem>>, %arg3: memref<2x32x32xf32, #tpu.memory_space<vmem>>, %arg4: memref<2x1x32xf32, #tpu.memory_space<vmem>>, %arg5: memref<2x1x32xf32, #tpu.memory_space<vmem>>, %arg6: memref<2x1x32xf32, #tpu.memory_space<vmem>>, %arg7: memref<2x32x64xf32, #tpu.memory_space<vmem>>, %arg8: memref<2x1x64xf32, #tpu.memory_space<vmem>>, %arg9: memref<2x64x32xf32, #tpu.memory_space<vmem>>, %arg10: memref<2x1x32xf32, #tpu.memory_space<vmem>>, %arg11: memref<2x1x32xf32, #tpu.memory_space<vmem>>, %arg12: memref<2x1x32xf32, #tpu.memory_space<vmem>>, %arg13: memref<16x32xf32, #tpu.memory_space<vmem>>) attributes {dimension_semantics = [], scalar_prefetch = 0 : i64, scratch_operands = 0 : i64, tpu.core_type = #tpu.core_type<tc>} {
    %c0 = arith.constant 0 : index
    %c0_0 = arith.constant 0 : index
    %0 = vector.load %arg0[%c0, %c0_0] : memref<16x32xf32, #tpu.memory_space<vmem>>, vector<16x32xf32>
    %c0_1 = arith.constant 0 : index
    %c0_2 = arith.constant 0 : index
    %c0_3 = arith.constant 0 : index
    %1 = vector.load %arg1[%c0_1, %c0_2, %c0_3] : memref<2x32x96xf32, #tpu.memory_space<vmem>>, vector<1x32x96xf32>
    %2 = vector.shape_cast %1 : vector<1x32x96xf32> to vector<32x96xf32>
    %c0_4 = arith.constant 0 : index
    %c0_5 = arith.constant 0 : index
    %c0_6 = arith.constant 0 : index
    %3 = vector.load %arg2[%c0_4, %c0_5, %c0_6] : memref<2x1x96xf32, #tpu.memory_space<vmem>>, vector<1x1x96xf32>
    %4 = vector.shape_cast %3 : vector<1x1x96xf32> to vector<1x96xf32>
    %c0_7 = arith.constant 0 : index
    %c0_8 = arith.constant 0 : index
    %c0_9 = arith.constant 0 : index
    %5 = vector.load %arg3[%c0_7, %c0_8, %c0_9] : memref<2x32x32xf32, #tpu.memory_space<vmem>>, vector<1x32x32xf32>
    %6 = vector.shape_cast %5 : vector<1x32x32xf32> to vector<32x32xf32>
    %c0_10 = arith.constant 0 : index
    %c0_11 = arith.constant 0 : index
    %c0_12 = arith.constant 0 : index
    %7 = vector.load %arg4[%c0_10, %c0_11, %c0_12] : memref<2x1x32xf32, #tpu.memory_space<vmem>>, vector<1x1x32xf32>
    %8 = vector.shape_cast %7 : vector<1x1x32xf32> to vector<1x32xf32>
    %c0_13 = arith.constant 0 : index
    %c0_14 = arith.constant 0 : index
    %c0_15 = arith.constant 0 : index
    %9 = vector.load %arg5[%c0_13, %c0_14, %c0_15] : memref<2x1x32xf32, #tpu.memory_space<vmem>>, vector<1x1x32xf32>
    %10 = vector.shape_cast %9 : vector<1x1x32xf32> to vector<1x32xf32>
    %c0_16 = arith.constant 0 : index
    %c0_17 = arith.constant 0 : index
    %c0_18 = arith.constant 0 : index
    %11 = vector.load %arg6[%c0_16, %c0_17, %c0_18] : memref<2x1x32xf32, #tpu.memory_space<vmem>>, vector<1x1x32xf32>
    %12 = vector.shape_cast %11 : vector<1x1x32xf32> to vector<1x32xf32>
    %c0_19 = arith.constant 0 : index
    %c0_20 = arith.constant 0 : index
    %c0_21 = arith.constant 0 : index
    %13 = vector.load %arg7[%c0_19, %c0_20, %c0_21] : memref<2x32x64xf32, #tpu.memory_space<vmem>>, vector<1x32x64xf32>
    %14 = vector.shape_cast %13 : vector<1x32x64xf32> to vector<32x64xf32>
    %c0_22 = arith.constant 0 : index
    %c0_23 = arith.constant 0 : index
    %c0_24 = arith.constant 0 : index
    %15 = vector.load %arg8[%c0_22, %c0_23, %c0_24] : memref<2x1x64xf32, #tpu.memory_space<vmem>>, vector<1x1x64xf32>
    %16 = vector.shape_cast %15 : vector<1x1x64xf32> to vector<1x64xf32>
    %c0_25 = arith.constant 0 : index
    %c0_26 = arith.constant 0 : index
    %c0_27 = arith.constant 0 : index
    %17 = vector.load %arg9[%c0_25, %c0_26, %c0_27] : memref<2x64x32xf32, #tpu.memory_space<vmem>>, vector<1x64x32xf32>
    %18 = vector.shape_cast %17 : vector<1x64x32xf32> to vector<64x32xf32>
    %c0_28 = arith.constant 0 : index
    %c0_29 = arith.constant 0 : index
    %c0_30 = arith.constant 0 : index
    %19 = vector.load %arg10[%c0_28, %c0_29, %c0_30] : memref<2x1x32xf32, #tpu.memory_space<vmem>>, vector<1x1x32xf32>
    %20 = vector.shape_cast %19 : vector<1x1x32xf32> to vector<1x32xf32>
    %c0_31 = arith.constant 0 : index
    %c0_32 = arith.constant 0 : index
    %c0_33 = arith.constant 0 : index
    %21 = vector.load %arg11[%c0_31, %c0_32, %c0_33] : memref<2x1x32xf32, #tpu.memory_space<vmem>>, vector<1x1x32xf32>
    %22 = vector.shape_cast %21 : vector<1x1x32xf32> to vector<1x32xf32>
    %c0_34 = arith.constant 0 : index
    %c0_35 = arith.constant 0 : index
    %c0_36 = arith.constant 0 : index
    %23 = vector.load %arg12[%c0_34, %c0_35, %c0_36] : memref<2x1x32xf32, #tpu.memory_space<vmem>>, vector<1x1x32xf32>
    %24 = vector.shape_cast %23 : vector<1x1x32xf32> to vector<1x32xf32>
    %cst = arith.constant dense<0.000000e+00> : vector<16x96xf32>
    %25 = tpu.matmul %0, %2, %cst {dimension_numbers = #tpu.dot_dimension_numbers<[1], [0], [0], [1], [0, 0, 1, 1], [], []>} : vector<16x32xf32>, vector<32x96xf32>, vector<16x96xf32> -> vector<16x96xf32>
    %26 = vector.broadcast %4 : vector<1x96xf32> to vector<16x96xf32>
    %27 = arith.addf %25, %26 : vector<16x96xf32>
    %cst_37 = arith.constant 0.000000e+00 : f32
    %28 = vector.broadcast %cst_37 : f32 to vector<8x32xf32>
    %29 = vector.extract_strided_slice %27 {offsets = [0, 0], sizes = [8, 8], strides = [1, 1]} : vector<16x96xf32> to vector<8x8xf32>
    %30 = vector.extract_strided_slice %27 {offsets = [0, 32], sizes = [8, 8], strides = [1, 1]} : vector<16x96xf32> to vector<8x8xf32>
    %31 = vector.extract_strided_slice %27 {offsets = [0, 64], sizes = [8, 8], strides = [1, 1]} : vector<16x96xf32> to vector<8x8xf32>
    %cst_38 = arith.constant dense<0.000000e+00> : vector<8x8xf32>
    %32 = tpu.matmul %29, %30, %cst_38 {dimension_numbers = #tpu.dot_dimension_numbers<[1], [1], [0], [0], [0, 0, 1, 0], [], []>} : vector<8x8xf32>, vector<8x8xf32>, vector<8x8xf32> -> vector<8x8xf32>
    %cst_39 = arith.constant 0.353553385 : f32
    %33 = vector.broadcast %cst_39 : f32 to vector<8x8xf32>
    %34 = arith.mulf %32, %33 : vector<8x8xf32>
    %cst_40 = arith.constant dense<0xFF800000> : vector<8xf32>
    %35 = vector.multi_reduction <maximumf>, %34, %cst_40 [1] : vector<8x8xf32> to vector<8xf32>
    %36 = vector.shape_cast %35 : vector<8xf32> to vector<8x1xf32>
    %37 = vector.broadcast %36 : vector<8x1xf32> to vector<8x8xf32>
    %38 = arith.subf %34, %37 : vector<8x8xf32>
    %39 = math.exp %38 : vector<8x8xf32>
    %cst_41 = arith.constant dense<0.000000e+00> : vector<8xf32>
    %40 = vector.multi_reduction <add>, %39, %cst_41 [1] : vector<8x8xf32> to vector<8xf32>
    %41 = vector.shape_cast %40 : vector<8xf32> to vector<8x1xf32>
    %42 = tpu.reciprocal %41 {approx = true} : vector<8x1xf32> -> vector<8x1xf32>
    %43 = vector.broadcast %42 : vector<8x1xf32> to vector<8x8xf32>
    %44 = arith.mulf %39, %43 : vector<8x8xf32>
    %cst_42 = arith.constant dense<0.000000e+00> : vector<8x8xf32>
    %45 = tpu.matmul %44, %31, %cst_42 {dimension_numbers = #tpu.dot_dimension_numbers<[1], [0], [0], [1], [0, 0, 1, 1], [], []>} : vector<8x8xf32>, vector<8x8xf32>, vector<8x8xf32> -> vector<8x8xf32>
    %46 = vector.extract_strided_slice %6 {offsets = [0, 0], sizes = [8, 32], strides = [1, 1]} : vector<32x32xf32> to vector<8x32xf32>
    %cst_43 = arith.constant dense<0.000000e+00> : vector<8x32xf32>
    %47 = tpu.matmul %45, %46, %cst_43 {dimension_numbers = #tpu.dot_dimension_numbers<[1], [0], [0], [1], [0, 0, 1, 1], [], []>} : vector<8x8xf32>, vector<8x32xf32>, vector<8x32xf32> -> vector<8x32xf32>
    %48 = arith.addf %28, %47 : vector<8x32xf32>
    %49 = vector.extract_strided_slice %27 {offsets = [0, 8], sizes = [8, 8], strides = [1, 1]} : vector<16x96xf32> to vector<8x8xf32>
    %50 = vector.extract_strided_slice %27 {offsets = [0, 40], sizes = [8, 8], strides = [1, 1]} : vector<16x96xf32> to vector<8x8xf32>
    %51 = vector.extract_strided_slice %27 {offsets = [0, 72], sizes = [8, 8], strides = [1, 1]} : vector<16x96xf32> to vector<8x8xf32>
    %cst_44 = arith.constant dense<0.000000e+00> : vector<8x8xf32>
    %52 = tpu.matmul %49, %50, %cst_44 {dimension_numbers = #tpu.dot_dimension_numbers<[1], [1], [0], [0], [0, 0, 1, 0], [], []>} : vector<8x8xf32>, vector<8x8xf32>, vector<8x8xf32> -> vector<8x8xf32>
    %cst_45 = arith.constant 0.353553385 : f32
    %53 = vector.broadcast %cst_45 : f32 to vector<8x8xf32>
    %54 = arith.mulf %52, %53 : vector<8x8xf32>
    %cst_46 = arith.constant dense<0xFF800000> : vector<8xf32>
    %55 = vector.multi_reduction <maximumf>, %54, %cst_46 [1] : vector<8x8xf32> to vector<8xf32>
    %56 = vector.shape_cast %55 : vector<8xf32> to vector<8x1xf32>
    %57 = vector.broadcast %56 : vector<8x1xf32> to vector<8x8xf32>
    %58 = arith.subf %54, %57 : vector<8x8xf32>
    %59 = math.exp %58 : vector<8x8xf32>
    %cst_47 = arith.constant dense<0.000000e+00> : vector<8xf32>
    %60 = vector.multi_reduction <add>, %59, %cst_47 [1] : vector<8x8xf32> to vector<8xf32>
    %61 = vector.shape_cast %60 : vector<8xf32> to vector<8x1xf32>
    %62 = tpu.reciprocal %61 {approx = true} : vector<8x1xf32> -> vector<8x1xf32>
    %63 = vector.broadcast %62 : vector<8x1xf32> to vector<8x8xf32>
    %64 = arith.mulf %59, %63 : vector<8x8xf32>
    %cst_48 = arith.constant dense<0.000000e+00> : vector<8x8xf32>
    %65 = tpu.matmul %64, %51, %cst_48 {dimension_numbers = #tpu.dot_dimension_numbers<[1], [0], [0], [1], [0, 0, 1, 1], [], []>} : vector<8x8xf32>, vector<8x8xf32>, vector<8x8xf32> -> vector<8x8xf32>
    %66 = vector.extract_strided_slice %6 {offsets = [8, 0], sizes = [8, 32], strides = [1, 1]} : vector<32x32xf32> to vector<8x32xf32>
    %cst_49 = arith.constant dense<0.000000e+00> : vector<8x32xf32>
    %67 = tpu.matmul %65, %66, %cst_49 {dimension_numbers = #tpu.dot_dimension_numbers<[1], [0], [0], [1], [0, 0, 1, 1], [], []>} : vector<8x8xf32>, vector<8x32xf32>, vector<8x32xf32> -> vector<8x32xf32>
    %68 = arith.addf %48, %67 : vector<8x32xf32>
    %69 = vector.extract_strided_slice %27 {offsets = [0, 16], sizes = [8, 8], strides = [1, 1]} : vector<16x96xf32> to vector<8x8xf32>
    %70 = vector.extract_strided_slice %27 {offsets = [0, 48], sizes = [8, 8], strides = [1, 1]} : vector<16x96xf32> to vector<8x8xf32>
    %71 = vector.extract_strided_slice %27 {offsets = [0, 80], sizes = [8, 8], strides = [1, 1]} : vector<16x96xf32> to vector<8x8xf32>
    %cst_50 = arith.constant dense<0.000000e+00> : vector<8x8xf32>
    %72 = tpu.matmul %69, %70, %cst_50 {dimension_numbers = #tpu.dot_dimension_numbers<[1], [1], [0], [0], [0, 0, 1, 0], [], []>} : vector<8x8xf32>, vector<8x8xf32>, vector<8x8xf32> -> vector<8x8xf32>
    %cst_51 = arith.constant 0.353553385 : f32
    %73 = vector.broadcast %cst_51 : f32 to vector<8x8xf32>
    %74 = arith.mulf %72, %73 : vector<8x8xf32>
    %cst_52 = arith.constant dense<0xFF800000> : vector<8xf32>
    %75 = vector.multi_reduction <maximumf>, %74, %cst_52 [1] : vector<8x8xf32> to vector<8xf32>
    %76 = vector.shape_cast %75 : vector<8xf32> to vector<8x1xf32>
    %77 = vector.broadcast %76 : vector<8x1xf32> to vector<8x8xf32>
    %78 = arith.subf %74, %77 : vector<8x8xf32>
    %79 = math.exp %78 : vector<8x8xf32>
    %cst_53 = arith.constant dense<0.000000e+00> : vector<8xf32>
    %80 = vector.multi_reduction <add>, %79, %cst_53 [1] : vector<8x8xf32> to vector<8xf32>
    %81 = vector.shape_cast %80 : vector<8xf32> to vector<8x1xf32>
    %82 = tpu.reciprocal %81 {approx = true} : vector<8x1xf32> -> vector<8x1xf32>
    %83 = vector.broadcast %82 : vector<8x1xf32> to vector<8x8xf32>
    %84 = arith.mulf %79, %83 : vector<8x8xf32>
    %cst_54 = arith.constant dense<0.000000e+00> : vector<8x8xf32>
    %85 = tpu.matmul %84, %71, %cst_54 {dimension_numbers = #tpu.dot_dimension_numbers<[1], [0], [0], [1], [0, 0, 1, 1], [], []>} : vector<8x8xf32>, vector<8x8xf32>, vector<8x8xf32> -> vector<8x8xf32>
    %86 = vector.extract_strided_slice %6 {offsets = [16, 0], sizes = [8, 32], strides = [1, 1]} : vector<32x32xf32> to vector<8x32xf32>
    %cst_55 = arith.constant dense<0.000000e+00> : vector<8x32xf32>
    %87 = tpu.matmul %85, %86, %cst_55 {dimension_numbers = #tpu.dot_dimension_numbers<[1], [0], [0], [1], [0, 0, 1, 1], [], []>} : vector<8x8xf32>, vector<8x32xf32>, vector<8x32xf32> -> vector<8x32xf32>
    %88 = arith.addf %68, %87 : vector<8x32xf32>
    %89 = vector.extract_strided_slice %27 {offsets = [0, 24], sizes = [8, 8], strides = [1, 1]} : vector<16x96xf32> to vector<8x8xf32>
    %90 = vector.extract_strided_slice %27 {offsets = [0, 56], sizes = [8, 8], strides = [1, 1]} : vector<16x96xf32> to vector<8x8xf32>
    %91 = vector.extract_strided_slice %27 {offsets = [0, 88], sizes = [8, 8], strides = [1, 1]} : vector<16x96xf32> to vector<8x8xf32>
    %cst_56 = arith.constant dense<0.000000e+00> : vector<8x8xf32>
    %92 = tpu.matmul %89, %90, %cst_56 {dimension_numbers = #tpu.dot_dimension_numbers<[1], [1], [0], [0], [0, 0, 1, 0], [], []>} : vector<8x8xf32>, vector<8x8xf32>, vector<8x8xf32> -> vector<8x8xf32>
    %cst_57 = arith.constant 0.353553385 : f32
    %93 = vector.broadcast %cst_57 : f32 to vector<8x8xf32>
    %94 = arith.mulf %92, %93 : vector<8x8xf32>
    %cst_58 = arith.constant dense<0xFF800000> : vector<8xf32>
    %95 = vector.multi_reduction <maximumf>, %94, %cst_58 [1] : vector<8x8xf32> to vector<8xf32>
    %96 = vector.shape_cast %95 : vector<8xf32> to vector<8x1xf32>
    %97 = vector.broadcast %96 : vector<8x1xf32> to vector<8x8xf32>
    %98 = arith.subf %94, %97 : vector<8x8xf32>
    %99 = math.exp %98 : vector<8x8xf32>
    %cst_59 = arith.constant dense<0.000000e+00> : vector<8xf32>
    %100 = vector.multi_reduction <add>, %99, %cst_59 [1] : vector<8x8xf32> to vector<8xf32>
    %101 = vector.shape_cast %100 : vector<8xf32> to vector<8x1xf32>
    %102 = tpu.reciprocal %101 {approx = true} : vector<8x1xf32> -> vector<8x1xf32>
    %103 = vector.broadcast %102 : vector<8x1xf32> to vector<8x8xf32>
    %104 = arith.mulf %99, %103 : vector<8x8xf32>
    %cst_60 = arith.constant dense<0.000000e+00> : vector<8x8xf32>
    %105 = tpu.matmul %104, %91, %cst_60 {dimension_numbers = #tpu.dot_dimension_numbers<[1], [0], [0], [1], [0, 0, 1, 1], [], []>} : vector<8x8xf32>, vector<8x8xf32>, vector<8x8xf32> -> vector<8x8xf32>
    %106 = vector.extract_strided_slice %6 {offsets = [24, 0], sizes = [8, 32], strides = [1, 1]} : vector<32x32xf32> to vector<8x32xf32>
    %cst_61 = arith.constant dense<0.000000e+00> : vector<8x32xf32>
    %107 = tpu.matmul %105, %106, %cst_61 {dimension_numbers = #tpu.dot_dimension_numbers<[1], [0], [0], [1], [0, 0, 1, 1], [], []>} : vector<8x8xf32>, vector<8x32xf32>, vector<8x32xf32> -> vector<8x32xf32>
    %108 = arith.addf %88, %107 : vector<8x32xf32>
    %cst_62 = arith.constant 0.000000e+00 : f32
    %109 = vector.broadcast %cst_62 : f32 to vector<8x32xf32>
    %110 = vector.extract_strided_slice %27 {offsets = [8, 0], sizes = [8, 8], strides = [1, 1]} : vector<16x96xf32> to vector<8x8xf32>
    %111 = vector.extract_strided_slice %27 {offsets = [8, 32], sizes = [8, 8], strides = [1, 1]} : vector<16x96xf32> to vector<8x8xf32>
    %112 = vector.extract_strided_slice %27 {offsets = [8, 64], sizes = [8, 8], strides = [1, 1]} : vector<16x96xf32> to vector<8x8xf32>
    %cst_63 = arith.constant dense<0.000000e+00> : vector<8x8xf32>
    %113 = tpu.matmul %110, %111, %cst_63 {dimension_numbers = #tpu.dot_dimension_numbers<[1], [1], [0], [0], [0, 0, 1, 0], [], []>} : vector<8x8xf32>, vector<8x8xf32>, vector<8x8xf32> -> vector<8x8xf32>
    %cst_64 = arith.constant 0.353553385 : f32
    %114 = vector.broadcast %cst_64 : f32 to vector<8x8xf32>
    %115 = arith.mulf %113, %114 : vector<8x8xf32>
    %cst_65 = arith.constant dense<0xFF800000> : vector<8xf32>
    %116 = vector.multi_reduction <maximumf>, %115, %cst_65 [1] : vector<8x8xf32> to vector<8xf32>
    %117 = vector.shape_cast %116 : vector<8xf32> to vector<8x1xf32>
    %118 = vector.broadcast %117 : vector<8x1xf32> to vector<8x8xf32>
    %119 = arith.subf %115, %118 : vector<8x8xf32>
    %120 = math.exp %119 : vector<8x8xf32>
    %cst_66 = arith.constant dense<0.000000e+00> : vector<8xf32>
    %121 = vector.multi_reduction <add>, %120, %cst_66 [1] : vector<8x8xf32> to vector<8xf32>
    %122 = vector.shape_cast %121 : vector<8xf32> to vector<8x1xf32>
    %123 = tpu.reciprocal %122 {approx = true} : vector<8x1xf32> -> vector<8x1xf32>
    %124 = vector.broadcast %123 : vector<8x1xf32> to vector<8x8xf32>
    %125 = arith.mulf %120, %124 : vector<8x8xf32>
    %cst_67 = arith.constant dense<0.000000e+00> : vector<8x8xf32>
    %126 = tpu.matmul %125, %112, %cst_67 {dimension_numbers = #tpu.dot_dimension_numbers<[1], [0], [0], [1], [0, 0, 1, 1], [], []>} : vector<8x8xf32>, vector<8x8xf32>, vector<8x8xf32> -> vector<8x8xf32>
    %127 = vector.extract_strided_slice %6 {offsets = [0, 0], sizes = [8, 32], strides = [1, 1]} : vector<32x32xf32> to vector<8x32xf32>
    %cst_68 = arith.constant dense<0.000000e+00> : vector<8x32xf32>
    %128 = tpu.matmul %126, %127, %cst_68 {dimension_numbers = #tpu.dot_dimension_numbers<[1], [0], [0], [1], [0, 0, 1, 1], [], []>} : vector<8x8xf32>, vector<8x32xf32>, vector<8x32xf32> -> vector<8x32xf32>
    %129 = arith.addf %109, %128 : vector<8x32xf32>
    %130 = vector.extract_strided_slice %27 {offsets = [8, 8], sizes = [8, 8], strides = [1, 1]} : vector<16x96xf32> to vector<8x8xf32>
    %131 = vector.extract_strided_slice %27 {offsets = [8, 40], sizes = [8, 8], strides = [1, 1]} : vector<16x96xf32> to vector<8x8xf32>
    %132 = vector.extract_strided_slice %27 {offsets = [8, 72], sizes = [8, 8], strides = [1, 1]} : vector<16x96xf32> to vector<8x8xf32>
    %cst_69 = arith.constant dense<0.000000e+00> : vector<8x8xf32>
    %133 = tpu.matmul %130, %131, %cst_69 {dimension_numbers = #tpu.dot_dimension_numbers<[1], [1], [0], [0], [0, 0, 1, 0], [], []>} : vector<8x8xf32>, vector<8x8xf32>, vector<8x8xf32> -> vector<8x8xf32>
    %cst_70 = arith.constant 0.353553385 : f32
    %134 = vector.broadcast %cst_70 : f32 to vector<8x8xf32>
    %135 = arith.mulf %133, %134 : vector<8x8xf32>
    %cst_71 = arith.constant dense<0xFF800000> : vector<8xf32>
    %136 = vector.multi_reduction <maximumf>, %135, %cst_71 [1] : vector<8x8xf32> to vector<8xf32>
    %137 = vector.shape_cast %136 : vector<8xf32> to vector<8x1xf32>
    %138 = vector.broadcast %137 : vector<8x1xf32> to vector<8x8xf32>
    %139 = arith.subf %135, %138 : vector<8x8xf32>
    %140 = math.exp %139 : vector<8x8xf32>
    %cst_72 = arith.constant dense<0.000000e+00> : vector<8xf32>
    %141 = vector.multi_reduction <add>, %140, %cst_72 [1] : vector<8x8xf32> to vector<8xf32>
    %142 = vector.shape_cast %141 : vector<8xf32> to vector<8x1xf32>
    %143 = tpu.reciprocal %142 {approx = true} : vector<8x1xf32> -> vector<8x1xf32>
    %144 = vector.broadcast %143 : vector<8x1xf32> to vector<8x8xf32>
    %145 = arith.mulf %140, %144 : vector<8x8xf32>
    %cst_73 = arith.constant dense<0.000000e+00> : vector<8x8xf32>
    %146 = tpu.matmul %145, %132, %cst_73 {dimension_numbers = #tpu.dot_dimension_numbers<[1], [0], [0], [1], [0, 0, 1, 1], [], []>} : vector<8x8xf32>, vector<8x8xf32>, vector<8x8xf32> -> vector<8x8xf32>
    %147 = vector.extract_strided_slice %6 {offsets = [8, 0], sizes = [8, 32], strides = [1, 1]} : vector<32x32xf32> to vector<8x32xf32>
    %cst_74 = arith.constant dense<0.000000e+00> : vector<8x32xf32>
    %148 = tpu.matmul %146, %147, %cst_74 {dimension_numbers = #tpu.dot_dimension_numbers<[1], [0], [0], [1], [0, 0, 1, 1], [], []>} : vector<8x8xf32>, vector<8x32xf32>, vector<8x32xf32> -> vector<8x32xf32>
    %149 = arith.addf %129, %148 : vector<8x32xf32>
    %150 = vector.extract_strided_slice %27 {offsets = [8, 16], sizes = [8, 8], strides = [1, 1]} : vector<16x96xf32> to vector<8x8xf32>
    %151 = vector.extract_strided_slice %27 {offsets = [8, 48], sizes = [8, 8], strides = [1, 1]} : vector<16x96xf32> to vector<8x8xf32>
    %152 = vector.extract_strided_slice %27 {offsets = [8, 80], sizes = [8, 8], strides = [1, 1]} : vector<16x96xf32> to vector<8x8xf32>
    %cst_75 = arith.constant dense<0.000000e+00> : vector<8x8xf32>
    %153 = tpu.matmul %150, %151, %cst_75 {dimension_numbers = #tpu.dot_dimension_numbers<[1], [1], [0], [0], [0, 0, 1, 0], [], []>} : vector<8x8xf32>, vector<8x8xf32>, vector<8x8xf32> -> vector<8x8xf32>
    %cst_76 = arith.constant 0.353553385 : f32
    %154 = vector.broadcast %cst_76 : f32 to vector<8x8xf32>
    %155 = arith.mulf %153, %154 : vector<8x8xf32>
    %cst_77 = arith.constant dense<0xFF800000> : vector<8xf32>
    %156 = vector.multi_reduction <maximumf>, %155, %cst_77 [1] : vector<8x8xf32> to vector<8xf32>
    %157 = vector.shape_cast %156 : vector<8xf32> to vector<8x1xf32>
    %158 = vector.broadcast %157 : vector<8x1xf32> to vector<8x8xf32>
    %159 = arith.subf %155, %158 : vector<8x8xf32>
    %160 = math.exp %159 : vector<8x8xf32>
    %cst_78 = arith.constant dense<0.000000e+00> : vector<8xf32>
    %161 = vector.multi_reduction <add>, %160, %cst_78 [1] : vector<8x8xf32> to vector<8xf32>
    %162 = vector.shape_cast %161 : vector<8xf32> to vector<8x1xf32>
    %163 = tpu.reciprocal %162 {approx = true} : vector<8x1xf32> -> vector<8x1xf32>
    %164 = vector.broadcast %163 : vector<8x1xf32> to vector<8x8xf32>
    %165 = arith.mulf %160, %164 : vector<8x8xf32>
    %cst_79 = arith.constant dense<0.000000e+00> : vector<8x8xf32>
    %166 = tpu.matmul %165, %152, %cst_79 {dimension_numbers = #tpu.dot_dimension_numbers<[1], [0], [0], [1], [0, 0, 1, 1], [], []>} : vector<8x8xf32>, vector<8x8xf32>, vector<8x8xf32> -> vector<8x8xf32>
    %167 = vector.extract_strided_slice %6 {offsets = [16, 0], sizes = [8, 32], strides = [1, 1]} : vector<32x32xf32> to vector<8x32xf32>
    %cst_80 = arith.constant dense<0.000000e+00> : vector<8x32xf32>
    %168 = tpu.matmul %166, %167, %cst_80 {dimension_numbers = #tpu.dot_dimension_numbers<[1], [0], [0], [1], [0, 0, 1, 1], [], []>} : vector<8x8xf32>, vector<8x32xf32>, vector<8x32xf32> -> vector<8x32xf32>
    %169 = arith.addf %149, %168 : vector<8x32xf32>
    %170 = vector.extract_strided_slice %27 {offsets = [8, 24], sizes = [8, 8], strides = [1, 1]} : vector<16x96xf32> to vector<8x8xf32>
    %171 = vector.extract_strided_slice %27 {offsets = [8, 56], sizes = [8, 8], strides = [1, 1]} : vector<16x96xf32> to vector<8x8xf32>
    %172 = vector.extract_strided_slice %27 {offsets = [8, 88], sizes = [8, 8], strides = [1, 1]} : vector<16x96xf32> to vector<8x8xf32>
    %cst_81 = arith.constant dense<0.000000e+00> : vector<8x8xf32>
    %173 = tpu.matmul %170, %171, %cst_81 {dimension_numbers = #tpu.dot_dimension_numbers<[1], [1], [0], [0], [0, 0, 1, 0], [], []>} : vector<8x8xf32>, vector<8x8xf32>, vector<8x8xf32> -> vector<8x8xf32>
    %cst_82 = arith.constant 0.353553385 : f32
    %174 = vector.broadcast %cst_82 : f32 to vector<8x8xf32>
    %175 = arith.mulf %173, %174 : vector<8x8xf32>
    %cst_83 = arith.constant dense<0xFF800000> : vector<8xf32>
    %176 = vector.multi_reduction <maximumf>, %175, %cst_83 [1] : vector<8x8xf32> to vector<8xf32>
    %177 = vector.shape_cast %176 : vector<8xf32> to vector<8x1xf32>
    %178 = vector.broadcast %177 : vector<8x1xf32> to vector<8x8xf32>
    %179 = arith.subf %175, %178 : vector<8x8xf32>
    %180 = math.exp %179 : vector<8x8xf32>
    %cst_84 = arith.constant dense<0.000000e+00> : vector<8xf32>
    %181 = vector.multi_reduction <add>, %180, %cst_84 [1] : vector<8x8xf32> to vector<8xf32>
    %182 = vector.shape_cast %181 : vector<8xf32> to vector<8x1xf32>
    %183 = tpu.reciprocal %182 {approx = true} : vector<8x1xf32> -> vector<8x1xf32>
    %184 = vector.broadcast %183 : vector<8x1xf32> to vector<8x8xf32>
    %185 = arith.mulf %180, %184 : vector<8x8xf32>
    %cst_85 = arith.constant dense<0.000000e+00> : vector<8x8xf32>
    %186 = tpu.matmul %185, %172, %cst_85 {dimension_numbers = #tpu.dot_dimension_numbers<[1], [0], [0], [1], [0, 0, 1, 1], [], []>} : vector<8x8xf32>, vector<8x8xf32>, vector<8x8xf32> -> vector<8x8xf32>
    %187 = vector.extract_strided_slice %6 {offsets = [24, 0], sizes = [8, 32], strides = [1, 1]} : vector<32x32xf32> to vector<8x32xf32>
    %cst_86 = arith.constant dense<0.000000e+00> : vector<8x32xf32>
    %188 = tpu.matmul %186, %187, %cst_86 {dimension_numbers = #tpu.dot_dimension_numbers<[1], [0], [0], [1], [0, 0, 1, 1], [], []>} : vector<8x8xf32>, vector<8x32xf32>, vector<8x32xf32> -> vector<8x32xf32>
    %189 = arith.addf %169, %188 : vector<8x32xf32>
    %190 = tpu.concatenate %108, %189 in 0 : vector<8x32xf32>, vector<8x32xf32> -> vector<16x32xf32>
    %191 = vector.broadcast %8 : vector<1x32xf32> to vector<16x32xf32>
    %192 = arith.addf %190, %191 : vector<16x32xf32>
    %193 = arith.addf %0, %192 : vector<16x32xf32>
    %cst_87 = arith.constant dense<0.000000e+00> : vector<16xf32>
    %194 = vector.multi_reduction <add>, %193, %cst_87 [1] : vector<16x32xf32> to vector<16xf32>
    %195 = vector.shape_cast %194 : vector<16xf32> to vector<16x1xf32>
    %cst_88 = arith.constant 3.200000e+01 : f32
    %196 = vector.broadcast %cst_88 : f32 to vector<16x1xf32>
    %197 = arith.divf %195, %196 : vector<16x1xf32>
    %198 = vector.broadcast %197 : vector<16x1xf32> to vector<16x32xf32>
    %199 = arith.subf %193, %198 : vector<16x32xf32>
    %200 = arith.mulf %199, %199 : vector<16x32xf32>
    %cst_89 = arith.constant dense<0.000000e+00> : vector<16xf32>
    %201 = vector.multi_reduction <add>, %200, %cst_89 [1] : vector<16x32xf32> to vector<16xf32>
    %202 = vector.shape_cast %201 : vector<16xf32> to vector<16x1xf32>
    %cst_90 = arith.constant 3.200000e+01 : f32
    %203 = vector.broadcast %cst_90 : f32 to vector<16x1xf32>
    %204 = arith.divf %202, %203 : vector<16x1xf32>
    %205 = vector.broadcast %197 : vector<16x1xf32> to vector<16x32xf32>
    %206 = arith.subf %193, %205 : vector<16x32xf32>
    %cst_91 = arith.constant 9.99999974E-6 : f32
    %207 = vector.broadcast %cst_91 : f32 to vector<16x1xf32>
    %208 = arith.addf %204, %207 : vector<16x1xf32>
    %209 = math.rsqrt %208 : vector<16x1xf32>
    %210 = vector.broadcast %209 : vector<16x1xf32> to vector<16x32xf32>
    %211 = arith.mulf %206, %210 : vector<16x32xf32>
    %212 = vector.broadcast %10 : vector<1x32xf32> to vector<16x32xf32>
    %213 = arith.mulf %211, %212 : vector<16x32xf32>
    %214 = vector.broadcast %12 : vector<1x32xf32> to vector<16x32xf32>
    %215 = arith.addf %213, %214 : vector<16x32xf32>
    %cst_92 = arith.constant dense<0.000000e+00> : vector<16x64xf32>
    %216 = tpu.matmul %215, %14, %cst_92 {dimension_numbers = #tpu.dot_dimension_numbers<[1], [0], [0], [1], [0, 0, 1, 1], [], []>} : vector<16x32xf32>, vector<32x64xf32>, vector<16x64xf32> -> vector<16x64xf32>
    %217 = vector.broadcast %16 : vector<1x64xf32> to vector<16x64xf32>
    %218 = arith.addf %216, %217 : vector<16x64xf32>
    %cst_93 = arith.constant 0.000000e+00 : f32
    %219 = vector.broadcast %cst_93 : f32 to vector<16x64xf32>
    %220 = arith.maximumf %218, %219 : vector<16x64xf32>
    %cst_94 = arith.constant dense<0.000000e+00> : vector<16x32xf32>
    %221 = tpu.matmul %220, %18, %cst_94 {dimension_numbers = #tpu.dot_dimension_numbers<[1], [0], [0], [1], [0, 0, 1, 1], [], []>} : vector<16x64xf32>, vector<64x32xf32>, vector<16x32xf32> -> vector<16x32xf32>
    %222 = vector.broadcast %20 : vector<1x32xf32> to vector<16x32xf32>
    %223 = arith.addf %221, %222 : vector<16x32xf32>
    %224 = arith.addf %215, %223 : vector<16x32xf32>
    %cst_95 = arith.constant dense<0.000000e+00> : vector<16xf32>
    %225 = vector.multi_reduction <add>, %224, %cst_95 [1] : vector<16x32xf32> to vector<16xf32>
    %226 = vector.shape_cast %225 : vector<16xf32> to vector<16x1xf32>
    %cst_96 = arith.constant 3.200000e+01 : f32
    %227 = vector.broadcast %cst_96 : f32 to vector<16x1xf32>
    %228 = arith.divf %226, %227 : vector<16x1xf32>
    %229 = vector.broadcast %228 : vector<16x1xf32> to vector<16x32xf32>
    %230 = arith.subf %224, %229 : vector<16x32xf32>
    %231 = arith.mulf %230, %230 : vector<16x32xf32>
    %cst_97 = arith.constant dense<0.000000e+00> : vector<16xf32>
    %232 = vector.multi_reduction <add>, %231, %cst_97 [1] : vector<16x32xf32> to vector<16xf32>
    %233 = vector.shape_cast %232 : vector<16xf32> to vector<16x1xf32>
    %cst_98 = arith.constant 3.200000e+01 : f32
    %234 = vector.broadcast %cst_98 : f32 to vector<16x1xf32>
    %235 = arith.divf %233, %234 : vector<16x1xf32>
    %236 = vector.broadcast %228 : vector<16x1xf32> to vector<16x32xf32>
    %237 = arith.subf %224, %236 : vector<16x32xf32>
    %cst_99 = arith.constant 9.99999974E-6 : f32
    %238 = vector.broadcast %cst_99 : f32 to vector<16x1xf32>
    %239 = arith.addf %235, %238 : vector<16x1xf32>
    %240 = math.rsqrt %239 : vector<16x1xf32>
    %241 = vector.broadcast %240 : vector<16x1xf32> to vector<16x32xf32>
    %242 = arith.mulf %237, %241 : vector<16x32xf32>
    %243 = vector.broadcast %22 : vector<1x32xf32> to vector<16x32xf32>
    %244 = arith.mulf %242, %243 : vector<16x32xf32>
    %245 = vector.broadcast %24 : vector<1x32xf32> to vector<16x32xf32>
    %246 = arith.addf %244, %245 : vector<16x32xf32>
    %c1 = arith.constant 1 : index
    %c0_100 = arith.constant 0 : index
    %c0_101 = arith.constant 0 : index
    %247 = vector.load %arg1[%c1, %c0_100, %c0_101] : memref<2x32x96xf32, #tpu.memory_space<vmem>>, vector<1x32x96xf32>
    %248 = vector.shape_cast %247 : vector<1x32x96xf32> to vector<32x96xf32>
    %c1_102 = arith.constant 1 : index
    %c0_103 = arith.constant 0 : index
    %c0_104 = arith.constant 0 : index
    %249 = vector.load %arg2[%c1_102, %c0_103, %c0_104] : memref<2x1x96xf32, #tpu.memory_space<vmem>>, vector<1x1x96xf32>
    %250 = vector.shape_cast %249 : vector<1x1x96xf32> to vector<1x96xf32>
    %c1_105 = arith.constant 1 : index
    %c0_106 = arith.constant 0 : index
    %c0_107 = arith.constant 0 : index
    %251 = vector.load %arg3[%c1_105, %c0_106, %c0_107] : memref<2x32x32xf32, #tpu.memory_space<vmem>>, vector<1x32x32xf32>
    %252 = vector.shape_cast %251 : vector<1x32x32xf32> to vector<32x32xf32>
    %c1_108 = arith.constant 1 : index
    %c0_109 = arith.constant 0 : index
    %c0_110 = arith.constant 0 : index
    %253 = vector.load %arg4[%c1_108, %c0_109, %c0_110] : memref<2x1x32xf32, #tpu.memory_space<vmem>>, vector<1x1x32xf32>
    %254 = vector.shape_cast %253 : vector<1x1x32xf32> to vector<1x32xf32>
    %c1_111 = arith.constant 1 : index
    %c0_112 = arith.constant 0 : index
    %c0_113 = arith.constant 0 : index
    %255 = vector.load %arg5[%c1_111, %c0_112, %c0_113] : memref<2x1x32xf32, #tpu.memory_space<vmem>>, vector<1x1x32xf32>
    %256 = vector.shape_cast %255 : vector<1x1x32xf32> to vector<1x32xf32>
    %c1_114 = arith.constant 1 : index
    %c0_115 = arith.constant 0 : index
    %c0_116 = arith.constant 0 : index
    %257 = vector.load %arg6[%c1_114, %c0_115, %c0_116] : memref<2x1x32xf32, #tpu.memory_space<vmem>>, vector<1x1x32xf32>
    %258 = vector.shape_cast %257 : vector<1x1x32xf32> to vector<1x32xf32>
    %c1_117 = arith.constant 1 : index
    %c0_118 = arith.constant 0 : index
    %c0_119 = arith.constant 0 : index
    %259 = vector.load %arg7[%c1_117, %c0_118, %c0_119] : memref<2x32x64xf32, #tpu.memory_space<vmem>>, vector<1x32x64xf32>
    %260 = vector.shape_cast %259 : vector<1x32x64xf32> to vector<32x64xf32>
    %c1_120 = arith.constant 1 : index
    %c0_121 = arith.constant 0 : index
    %c0_122 = arith.constant 0 : index
    %261 = vector.load %arg8[%c1_120, %c0_121, %c0_122] : memref<2x1x64xf32, #tpu.memory_space<vmem>>, vector<1x1x64xf32>
    %262 = vector.shape_cast %261 : vector<1x1x64xf32> to vector<1x64xf32>
    %c1_123 = arith.constant 1 : index
    %c0_124 = arith.constant 0 : index
    %c0_125 = arith.constant 0 : index
    %263 = vector.load %arg9[%c1_123, %c0_124, %c0_125] : memref<2x64x32xf32, #tpu.memory_space<vmem>>, vector<1x64x32xf32>
    %264 = vector.shape_cast %263 : vector<1x64x32xf32> to vector<64x32xf32>
    %c1_126 = arith.constant 1 : index
    %c0_127 = arith.constant 0 : index
    %c0_128 = arith.constant 0 : index
    %265 = vector.load %arg10[%c1_126, %c0_127, %c0_128] : memref<2x1x32xf32, #tpu.memory_space<vmem>>, vector<1x1x32xf32>
    %266 = vector.shape_cast %265 : vector<1x1x32xf32> to vector<1x32xf32>
    %c1_129 = arith.constant 1 : index
    %c0_130 = arith.constant 0 : index
    %c0_131 = arith.constant 0 : index
    %267 = vector.load %arg11[%c1_129, %c0_130, %c0_131] : memref<2x1x32xf32, #tpu.memory_space<vmem>>, vector<1x1x32xf32>
    %268 = vector.shape_cast %267 : vector<1x1x32xf32> to vector<1x32xf32>
    %c1_132 = arith.constant 1 : index
    %c0_133 = arith.constant 0 : index
    %c0_134 = arith.constant 0 : index
    %269 = vector.load %arg12[%c1_132, %c0_133, %c0_134] : memref<2x1x32xf32, #tpu.memory_space<vmem>>, vector<1x1x32xf32>
    %270 = vector.shape_cast %269 : vector<1x1x32xf32> to vector<1x32xf32>
    %cst_135 = arith.constant dense<0.000000e+00> : vector<16x96xf32>
    %271 = tpu.matmul %246, %248, %cst_135 {dimension_numbers = #tpu.dot_dimension_numbers<[1], [0], [0], [1], [0, 0, 1, 1], [], []>} : vector<16x32xf32>, vector<32x96xf32>, vector<16x96xf32> -> vector<16x96xf32>
    %272 = vector.broadcast %250 : vector<1x96xf32> to vector<16x96xf32>
    %273 = arith.addf %271, %272 : vector<16x96xf32>
    %cst_136 = arith.constant 0.000000e+00 : f32
    %274 = vector.broadcast %cst_136 : f32 to vector<8x32xf32>
    %275 = vector.extract_strided_slice %273 {offsets = [0, 0], sizes = [8, 8], strides = [1, 1]} : vector<16x96xf32> to vector<8x8xf32>
    %276 = vector.extract_strided_slice %273 {offsets = [0, 32], sizes = [8, 8], strides = [1, 1]} : vector<16x96xf32> to vector<8x8xf32>
    %277 = vector.extract_strided_slice %273 {offsets = [0, 64], sizes = [8, 8], strides = [1, 1]} : vector<16x96xf32> to vector<8x8xf32>
    %cst_137 = arith.constant dense<0.000000e+00> : vector<8x8xf32>
    %278 = tpu.matmul %275, %276, %cst_137 {dimension_numbers = #tpu.dot_dimension_numbers<[1], [1], [0], [0], [0, 0, 1, 0], [], []>} : vector<8x8xf32>, vector<8x8xf32>, vector<8x8xf32> -> vector<8x8xf32>
    %cst_138 = arith.constant 0.353553385 : f32
    %279 = vector.broadcast %cst_138 : f32 to vector<8x8xf32>
    %280 = arith.mulf %278, %279 : vector<8x8xf32>
    %cst_139 = arith.constant dense<0xFF800000> : vector<8xf32>
    %281 = vector.multi_reduction <maximumf>, %280, %cst_139 [1] : vector<8x8xf32> to vector<8xf32>
    %282 = vector.shape_cast %281 : vector<8xf32> to vector<8x1xf32>
    %283 = vector.broadcast %282 : vector<8x1xf32> to vector<8x8xf32>
    %284 = arith.subf %280, %283 : vector<8x8xf32>
    %285 = math.exp %284 : vector<8x8xf32>
    %cst_140 = arith.constant dense<0.000000e+00> : vector<8xf32>
    %286 = vector.multi_reduction <add>, %285, %cst_140 [1] : vector<8x8xf32> to vector<8xf32>
    %287 = vector.shape_cast %286 : vector<8xf32> to vector<8x1xf32>
    %288 = tpu.reciprocal %287 {approx = true} : vector<8x1xf32> -> vector<8x1xf32>
    %289 = vector.broadcast %288 : vector<8x1xf32> to vector<8x8xf32>
    %290 = arith.mulf %285, %289 : vector<8x8xf32>
    %cst_141 = arith.constant dense<0.000000e+00> : vector<8x8xf32>
    %291 = tpu.matmul %290, %277, %cst_141 {dimension_numbers = #tpu.dot_dimension_numbers<[1], [0], [0], [1], [0, 0, 1, 1], [], []>} : vector<8x8xf32>, vector<8x8xf32>, vector<8x8xf32> -> vector<8x8xf32>
    %292 = vector.extract_strided_slice %252 {offsets = [0, 0], sizes = [8, 32], strides = [1, 1]} : vector<32x32xf32> to vector<8x32xf32>
    %cst_142 = arith.constant dense<0.000000e+00> : vector<8x32xf32>
    %293 = tpu.matmul %291, %292, %cst_142 {dimension_numbers = #tpu.dot_dimension_numbers<[1], [0], [0], [1], [0, 0, 1, 1], [], []>} : vector<8x8xf32>, vector<8x32xf32>, vector<8x32xf32> -> vector<8x32xf32>
    %294 = arith.addf %274, %293 : vector<8x32xf32>
    %295 = vector.extract_strided_slice %273 {offsets = [0, 8], sizes = [8, 8], strides = [1, 1]} : vector<16x96xf32> to vector<8x8xf32>
    %296 = vector.extract_strided_slice %273 {offsets = [0, 40], sizes = [8, 8], strides = [1, 1]} : vector<16x96xf32> to vector<8x8xf32>
    %297 = vector.extract_strided_slice %273 {offsets = [0, 72], sizes = [8, 8], strides = [1, 1]} : vector<16x96xf32> to vector<8x8xf32>
    %cst_143 = arith.constant dense<0.000000e+00> : vector<8x8xf32>
    %298 = tpu.matmul %295, %296, %cst_143 {dimension_numbers = #tpu.dot_dimension_numbers<[1], [1], [0], [0], [0, 0, 1, 0], [], []>} : vector<8x8xf32>, vector<8x8xf32>, vector<8x8xf32> -> vector<8x8xf32>
    %cst_144 = arith.constant 0.353553385 : f32
    %299 = vector.broadcast %cst_144 : f32 to vector<8x8xf32>
    %300 = arith.mulf %298, %299 : vector<8x8xf32>
    %cst_145 = arith.constant dense<0xFF800000> : vector<8xf32>
    %301 = vector.multi_reduction <maximumf>, %300, %cst_145 [1] : vector<8x8xf32> to vector<8xf32>
    %302 = vector.shape_cast %301 : vector<8xf32> to vector<8x1xf32>
    %303 = vector.broadcast %302 : vector<8x1xf32> to vector<8x8xf32>
    %304 = arith.subf %300, %303 : vector<8x8xf32>
    %305 = math.exp %304 : vector<8x8xf32>
    %cst_146 = arith.constant dense<0.000000e+00> : vector<8xf32>
    %306 = vector.multi_reduction <add>, %305, %cst_146 [1] : vector<8x8xf32> to vector<8xf32>
    %307 = vector.shape_cast %306 : vector<8xf32> to vector<8x1xf32>
    %308 = tpu.reciprocal %307 {approx = true} : vector<8x1xf32> -> vector<8x1xf32>
    %309 = vector.broadcast %308 : vector<8x1xf32> to vector<8x8xf32>
    %310 = arith.mulf %305, %309 : vector<8x8xf32>
    %cst_147 = arith.constant dense<0.000000e+00> : vector<8x8xf32>
    %311 = tpu.matmul %310, %297, %cst_147 {dimension_numbers = #tpu.dot_dimension_numbers<[1], [0], [0], [1], [0, 0, 1, 1], [], []>} : vector<8x8xf32>, vector<8x8xf32>, vector<8x8xf32> -> vector<8x8xf32>
    %312 = vector.extract_strided_slice %252 {offsets = [8, 0], sizes = [8, 32], strides = [1, 1]} : vector<32x32xf32> to vector<8x32xf32>
    %cst_148 = arith.constant dense<0.000000e+00> : vector<8x32xf32>
    %313 = tpu.matmul %311, %312, %cst_148 {dimension_numbers = #tpu.dot_dimension_numbers<[1], [0], [0], [1], [0, 0, 1, 1], [], []>} : vector<8x8xf32>, vector<8x32xf32>, vector<8x32xf32> -> vector<8x32xf32>
    %314 = arith.addf %294, %313 : vector<8x32xf32>
    %315 = vector.extract_strided_slice %273 {offsets = [0, 16], sizes = [8, 8], strides = [1, 1]} : vector<16x96xf32> to vector<8x8xf32>
    %316 = vector.extract_strided_slice %273 {offsets = [0, 48], sizes = [8, 8], strides = [1, 1]} : vector<16x96xf32> to vector<8x8xf32>
    %317 = vector.extract_strided_slice %273 {offsets = [0, 80], sizes = [8, 8], strides = [1, 1]} : vector<16x96xf32> to vector<8x8xf32>
    %cst_149 = arith.constant dense<0.000000e+00> : vector<8x8xf32>
    %318 = tpu.matmul %315, %316, %cst_149 {dimension_numbers = #tpu.dot_dimension_numbers<[1], [1], [0], [0], [0, 0, 1, 0], [], []>} : vector<8x8xf32>, vector<8x8xf32>, vector<8x8xf32> -> vector<8x8xf32>
    %cst_150 = arith.constant 0.353553385 : f32
    %319 = vector.broadcast %cst_150 : f32 to vector<8x8xf32>
    %320 = arith.mulf %318, %319 : vector<8x8xf32>
    %cst_151 = arith.constant dense<0xFF800000> : vector<8xf32>
    %321 = vector.multi_reduction <maximumf>, %320, %cst_151 [1] : vector<8x8xf32> to vector<8xf32>
    %322 = vector.shape_cast %321 : vector<8xf32> to vector<8x1xf32>
    %323 = vector.broadcast %322 : vector<8x1xf32> to vector<8x8xf32>
    %324 = arith.subf %320, %323 : vector<8x8xf32>
    %325 = math.exp %324 : vector<8x8xf32>
    %cst_152 = arith.constant dense<0.000000e+00> : vector<8xf32>
    %326 = vector.multi_reduction <add>, %325, %cst_152 [1] : vector<8x8xf32> to vector<8xf32>
    %327 = vector.shape_cast %326 : vector<8xf32> to vector<8x1xf32>
    %328 = tpu.reciprocal %327 {approx = true} : vector<8x1xf32> -> vector<8x1xf32>
    %329 = vector.broadcast %328 : vector<8x1xf32> to vector<8x8xf32>
    %330 = arith.mulf %325, %329 : vector<8x8xf32>
    %cst_153 = arith.constant dense<0.000000e+00> : vector<8x8xf32>
    %331 = tpu.matmul %330, %317, %cst_153 {dimension_numbers = #tpu.dot_dimension_numbers<[1], [0], [0], [1], [0, 0, 1, 1], [], []>} : vector<8x8xf32>, vector<8x8xf32>, vector<8x8xf32> -> vector<8x8xf32>
    %332 = vector.extract_strided_slice %252 {offsets = [16, 0], sizes = [8, 32], strides = [1, 1]} : vector<32x32xf32> to vector<8x32xf32>
    %cst_154 = arith.constant dense<0.000000e+00> : vector<8x32xf32>
    %333 = tpu.matmul %331, %332, %cst_154 {dimension_numbers = #tpu.dot_dimension_numbers<[1], [0], [0], [1], [0, 0, 1, 1], [], []>} : vector<8x8xf32>, vector<8x32xf32>, vector<8x32xf32> -> vector<8x32xf32>
    %334 = arith.addf %314, %333 : vector<8x32xf32>
    %335 = vector.extract_strided_slice %273 {offsets = [0, 24], sizes = [8, 8], strides = [1, 1]} : vector<16x96xf32> to vector<8x8xf32>
    %336 = vector.extract_strided_slice %273 {offsets = [0, 56], sizes = [8, 8], strides = [1, 1]} : vector<16x96xf32> to vector<8x8xf32>
    %337 = vector.extract_strided_slice %273 {offsets = [0, 88], sizes = [8, 8], strides = [1, 1]} : vector<16x96xf32> to vector<8x8xf32>
    %cst_155 = arith.constant dense<0.000000e+00> : vector<8x8xf32>
    %338 = tpu.matmul %335, %336, %cst_155 {dimension_numbers = #tpu.dot_dimension_numbers<[1], [1], [0], [0], [0, 0, 1, 0], [], []>} : vector<8x8xf32>, vector<8x8xf32>, vector<8x8xf32> -> vector<8x8xf32>
    %cst_156 = arith.constant 0.353553385 : f32
    %339 = vector.broadcast %cst_156 : f32 to vector<8x8xf32>
    %340 = arith.mulf %338, %339 : vector<8x8xf32>
    %cst_157 = arith.constant dense<0xFF800000> : vector<8xf32>
    %341 = vector.multi_reduction <maximumf>, %340, %cst_157 [1] : vector<8x8xf32> to vector<8xf32>
    %342 = vector.shape_cast %341 : vector<8xf32> to vector<8x1xf32>
    %343 = vector.broadcast %342 : vector<8x1xf32> to vector<8x8xf32>
    %344 = arith.subf %340, %343 : vector<8x8xf32>
    %345 = math.exp %344 : vector<8x8xf32>
    %cst_158 = arith.constant dense<0.000000e+00> : vector<8xf32>
    %346 = vector.multi_reduction <add>, %345, %cst_158 [1] : vector<8x8xf32> to vector<8xf32>
    %347 = vector.shape_cast %346 : vector<8xf32> to vector<8x1xf32>
    %348 = tpu.reciprocal %347 {approx = true} : vector<8x1xf32> -> vector<8x1xf32>
    %349 = vector.broadcast %348 : vector<8x1xf32> to vector<8x8xf32>
    %350 = arith.mulf %345, %349 : vector<8x8xf32>
    %cst_159 = arith.constant dense<0.000000e+00> : vector<8x8xf32>
    %351 = tpu.matmul %350, %337, %cst_159 {dimension_numbers = #tpu.dot_dimension_numbers<[1], [0], [0], [1], [0, 0, 1, 1], [], []>} : vector<8x8xf32>, vector<8x8xf32>, vector<8x8xf32> -> vector<8x8xf32>
    %352 = vector.extract_strided_slice %252 {offsets = [24, 0], sizes = [8, 32], strides = [1, 1]} : vector<32x32xf32> to vector<8x32xf32>
    %cst_160 = arith.constant dense<0.000000e+00> : vector<8x32xf32>
    %353 = tpu.matmul %351, %352, %cst_160 {dimension_numbers = #tpu.dot_dimension_numbers<[1], [0], [0], [1], [0, 0, 1, 1], [], []>} : vector<8x8xf32>, vector<8x32xf32>, vector<8x32xf32> -> vector<8x32xf32>
    %354 = arith.addf %334, %353 : vector<8x32xf32>
    %cst_161 = arith.constant 0.000000e+00 : f32
    %355 = vector.broadcast %cst_161 : f32 to vector<8x32xf32>
    %356 = vector.extract_strided_slice %273 {offsets = [8, 0], sizes = [8, 8], strides = [1, 1]} : vector<16x96xf32> to vector<8x8xf32>
    %357 = vector.extract_strided_slice %273 {offsets = [8, 32], sizes = [8, 8], strides = [1, 1]} : vector<16x96xf32> to vector<8x8xf32>
    %358 = vector.extract_strided_slice %273 {offsets = [8, 64], sizes = [8, 8], strides = [1, 1]} : vector<16x96xf32> to vector<8x8xf32>
    %cst_162 = arith.constant dense<0.000000e+00> : vector<8x8xf32>
    %359 = tpu.matmul %356, %357, %cst_162 {dimension_numbers = #tpu.dot_dimension_numbers<[1], [1], [0], [0], [0, 0, 1, 0], [], []>} : vector<8x8xf32>, vector<8x8xf32>, vector<8x8xf32> -> vector<8x8xf32>
    %cst_163 = arith.constant 0.353553385 : f32
    %360 = vector.broadcast %cst_163 : f32 to vector<8x8xf32>
    %361 = arith.mulf %359, %360 : vector<8x8xf32>
    %cst_164 = arith.constant dense<0xFF800000> : vector<8xf32>
    %362 = vector.multi_reduction <maximumf>, %361, %cst_164 [1] : vector<8x8xf32> to vector<8xf32>
    %363 = vector.shape_cast %362 : vector<8xf32> to vector<8x1xf32>
    %364 = vector.broadcast %363 : vector<8x1xf32> to vector<8x8xf32>
    %365 = arith.subf %361, %364 : vector<8x8xf32>
    %366 = math.exp %365 : vector<8x8xf32>
    %cst_165 = arith.constant dense<0.000000e+00> : vector<8xf32>
    %367 = vector.multi_reduction <add>, %366, %cst_165 [1] : vector<8x8xf32> to vector<8xf32>
    %368 = vector.shape_cast %367 : vector<8xf32> to vector<8x1xf32>
    %369 = tpu.reciprocal %368 {approx = true} : vector<8x1xf32> -> vector<8x1xf32>
    %370 = vector.broadcast %369 : vector<8x1xf32> to vector<8x8xf32>
    %371 = arith.mulf %366, %370 : vector<8x8xf32>
    %cst_166 = arith.constant dense<0.000000e+00> : vector<8x8xf32>
    %372 = tpu.matmul %371, %358, %cst_166 {dimension_numbers = #tpu.dot_dimension_numbers<[1], [0], [0], [1], [0, 0, 1, 1], [], []>} : vector<8x8xf32>, vector<8x8xf32>, vector<8x8xf32> -> vector<8x8xf32>
    %373 = vector.extract_strided_slice %252 {offsets = [0, 0], sizes = [8, 32], strides = [1, 1]} : vector<32x32xf32> to vector<8x32xf32>
    %cst_167 = arith.constant dense<0.000000e+00> : vector<8x32xf32>
    %374 = tpu.matmul %372, %373, %cst_167 {dimension_numbers = #tpu.dot_dimension_numbers<[1], [0], [0], [1], [0, 0, 1, 1], [], []>} : vector<8x8xf32>, vector<8x32xf32>, vector<8x32xf32> -> vector<8x32xf32>
    %375 = arith.addf %355, %374 : vector<8x32xf32>
    %376 = vector.extract_strided_slice %273 {offsets = [8, 8], sizes = [8, 8], strides = [1, 1]} : vector<16x96xf32> to vector<8x8xf32>
    %377 = vector.extract_strided_slice %273 {offsets = [8, 40], sizes = [8, 8], strides = [1, 1]} : vector<16x96xf32> to vector<8x8xf32>
    %378 = vector.extract_strided_slice %273 {offsets = [8, 72], sizes = [8, 8], strides = [1, 1]} : vector<16x96xf32> to vector<8x8xf32>
    %cst_168 = arith.constant dense<0.000000e+00> : vector<8x8xf32>
    %379 = tpu.matmul %376, %377, %cst_168 {dimension_numbers = #tpu.dot_dimension_numbers<[1], [1], [0], [0], [0, 0, 1, 0], [], []>} : vector<8x8xf32>, vector<8x8xf32>, vector<8x8xf32> -> vector<8x8xf32>
    %cst_169 = arith.constant 0.353553385 : f32
    %380 = vector.broadcast %cst_169 : f32 to vector<8x8xf32>
    %381 = arith.mulf %379, %380 : vector<8x8xf32>
    %cst_170 = arith.constant dense<0xFF800000> : vector<8xf32>
    %382 = vector.multi_reduction <maximumf>, %381, %cst_170 [1] : vector<8x8xf32> to vector<8xf32>
    %383 = vector.shape_cast %382 : vector<8xf32> to vector<8x1xf32>
    %384 = vector.broadcast %383 : vector<8x1xf32> to vector<8x8xf32>
    %385 = arith.subf %381, %384 : vector<8x8xf32>
    %386 = math.exp %385 : vector<8x8xf32>
    %cst_171 = arith.constant dense<0.000000e+00> : vector<8xf32>
    %387 = vector.multi_reduction <add>, %386, %cst_171 [1] : vector<8x8xf32> to vector<8xf32>
    %388 = vector.shape_cast %387 : vector<8xf32> to vector<8x1xf32>
    %389 = tpu.reciprocal %388 {approx = true} : vector<8x1xf32> -> vector<8x1xf32>
    %390 = vector.broadcast %389 : vector<8x1xf32> to vector<8x8xf32>
    %391 = arith.mulf %386, %390 : vector<8x8xf32>
    %cst_172 = arith.constant dense<0.000000e+00> : vector<8x8xf32>
    %392 = tpu.matmul %391, %378, %cst_172 {dimension_numbers = #tpu.dot_dimension_numbers<[1], [0], [0], [1], [0, 0, 1, 1], [], []>} : vector<8x8xf32>, vector<8x8xf32>, vector<8x8xf32> -> vector<8x8xf32>
    %393 = vector.extract_strided_slice %252 {offsets = [8, 0], sizes = [8, 32], strides = [1, 1]} : vector<32x32xf32> to vector<8x32xf32>
    %cst_173 = arith.constant dense<0.000000e+00> : vector<8x32xf32>
    %394 = tpu.matmul %392, %393, %cst_173 {dimension_numbers = #tpu.dot_dimension_numbers<[1], [0], [0], [1], [0, 0, 1, 1], [], []>} : vector<8x8xf32>, vector<8x32xf32>, vector<8x32xf32> -> vector<8x32xf32>
    %395 = arith.addf %375, %394 : vector<8x32xf32>
    %396 = vector.extract_strided_slice %273 {offsets = [8, 16], sizes = [8, 8], strides = [1, 1]} : vector<16x96xf32> to vector<8x8xf32>
    %397 = vector.extract_strided_slice %273 {offsets = [8, 48], sizes = [8, 8], strides = [1, 1]} : vector<16x96xf32> to vector<8x8xf32>
    %398 = vector.extract_strided_slice %273 {offsets = [8, 80], sizes = [8, 8], strides = [1, 1]} : vector<16x96xf32> to vector<8x8xf32>
    %cst_174 = arith.constant dense<0.000000e+00> : vector<8x8xf32>
    %399 = tpu.matmul %396, %397, %cst_174 {dimension_numbers = #tpu.dot_dimension_numbers<[1], [1], [0], [0], [0, 0, 1, 0], [], []>} : vector<8x8xf32>, vector<8x8xf32>, vector<8x8xf32> -> vector<8x8xf32>
    %cst_175 = arith.constant 0.353553385 : f32
    %400 = vector.broadcast %cst_175 : f32 to vector<8x8xf32>
    %401 = arith.mulf %399, %400 : vector<8x8xf32>
    %cst_176 = arith.constant dense<0xFF800000> : vector<8xf32>
    %402 = vector.multi_reduction <maximumf>, %401, %cst_176 [1] : vector<8x8xf32> to vector<8xf32>
    %403 = vector.shape_cast %402 : vector<8xf32> to vector<8x1xf32>
    %404 = vector.broadcast %403 : vector<8x1xf32> to vector<8x8xf32>
    %405 = arith.subf %401, %404 : vector<8x8xf32>
    %406 = math.exp %405 : vector<8x8xf32>
    %cst_177 = arith.constant dense<0.000000e+00> : vector<8xf32>
    %407 = vector.multi_reduction <add>, %406, %cst_177 [1] : vector<8x8xf32> to vector<8xf32>
    %408 = vector.shape_cast %407 : vector<8xf32> to vector<8x1xf32>
    %409 = tpu.reciprocal %408 {approx = true} : vector<8x1xf32> -> vector<8x1xf32>
    %410 = vector.broadcast %409 : vector<8x1xf32> to vector<8x8xf32>
    %411 = arith.mulf %406, %410 : vector<8x8xf32>
    %cst_178 = arith.constant dense<0.000000e+00> : vector<8x8xf32>
    %412 = tpu.matmul %411, %398, %cst_178 {dimension_numbers = #tpu.dot_dimension_numbers<[1], [0], [0], [1], [0, 0, 1, 1], [], []>} : vector<8x8xf32>, vector<8x8xf32>, vector<8x8xf32> -> vector<8x8xf32>
    %413 = vector.extract_strided_slice %252 {offsets = [16, 0], sizes = [8, 32], strides = [1, 1]} : vector<32x32xf32> to vector<8x32xf32>
    %cst_179 = arith.constant dense<0.000000e+00> : vector<8x32xf32>
    %414 = tpu.matmul %412, %413, %cst_179 {dimension_numbers = #tpu.dot_dimension_numbers<[1], [0], [0], [1], [0, 0, 1, 1], [], []>} : vector<8x8xf32>, vector<8x32xf32>, vector<8x32xf32> -> vector<8x32xf32>
    %415 = arith.addf %395, %414 : vector<8x32xf32>
    %416 = vector.extract_strided_slice %273 {offsets = [8, 24], sizes = [8, 8], strides = [1, 1]} : vector<16x96xf32> to vector<8x8xf32>
    %417 = vector.extract_strided_slice %273 {offsets = [8, 56], sizes = [8, 8], strides = [1, 1]} : vector<16x96xf32> to vector<8x8xf32>
    %418 = vector.extract_strided_slice %273 {offsets = [8, 88], sizes = [8, 8], strides = [1, 1]} : vector<16x96xf32> to vector<8x8xf32>
    %cst_180 = arith.constant dense<0.000000e+00> : vector<8x8xf32>
    %419 = tpu.matmul %416, %417, %cst_180 {dimension_numbers = #tpu.dot_dimension_numbers<[1], [1], [0], [0], [0, 0, 1, 0], [], []>} : vector<8x8xf32>, vector<8x8xf32>, vector<8x8xf32> -> vector<8x8xf32>
    %cst_181 = arith.constant 0.353553385 : f32
    %420 = vector.broadcast %cst_181 : f32 to vector<8x8xf32>
    %421 = arith.mulf %419, %420 : vector<8x8xf32>
    %cst_182 = arith.constant dense<0xFF800000> : vector<8xf32>
    %422 = vector.multi_reduction <maximumf>, %421, %cst_182 [1] : vector<8x8xf32> to vector<8xf32>
    %423 = vector.shape_cast %422 : vector<8xf32> to vector<8x1xf32>
    %424 = vector.broadcast %423 : vector<8x1xf32> to vector<8x8xf32>
    %425 = arith.subf %421, %424 : vector<8x8xf32>
    %426 = math.exp %425 : vector<8x8xf32>
    %cst_183 = arith.constant dense<0.000000e+00> : vector<8xf32>
    %427 = vector.multi_reduction <add>, %426, %cst_183 [1] : vector<8x8xf32> to vector<8xf32>
    %428 = vector.shape_cast %427 : vector<8xf32> to vector<8x1xf32>
    %429 = tpu.reciprocal %428 {approx = true} : vector<8x1xf32> -> vector<8x1xf32>
    %430 = vector.broadcast %429 : vector<8x1xf32> to vector<8x8xf32>
    %431 = arith.mulf %426, %430 : vector<8x8xf32>
    %cst_184 = arith.constant dense<0.000000e+00> : vector<8x8xf32>
    %432 = tpu.matmul %431, %418, %cst_184 {dimension_numbers = #tpu.dot_dimension_numbers<[1], [0], [0], [1], [0, 0, 1, 1], [], []>} : vector<8x8xf32>, vector<8x8xf32>, vector<8x8xf32> -> vector<8x8xf32>
    %433 = vector.extract_strided_slice %252 {offsets = [24, 0], sizes = [8, 32], strides = [1, 1]} : vector<32x32xf32> to vector<8x32xf32>
    %cst_185 = arith.constant dense<0.000000e+00> : vector<8x32xf32>
    %434 = tpu.matmul %432, %433, %cst_185 {dimension_numbers = #tpu.dot_dimension_numbers<[1], [0], [0], [1], [0, 0, 1, 1], [], []>} : vector<8x8xf32>, vector<8x32xf32>, vector<8x32xf32> -> vector<8x32xf32>
    %435 = arith.addf %415, %434 : vector<8x32xf32>
    %436 = tpu.concatenate %354, %435 in 0 : vector<8x32xf32>, vector<8x32xf32> -> vector<16x32xf32>
    %437 = vector.broadcast %254 : vector<1x32xf32> to vector<16x32xf32>
    %438 = arith.addf %436, %437 : vector<16x32xf32>
    %439 = arith.addf %246, %438 : vector<16x32xf32>
    %cst_186 = arith.constant dense<0.000000e+00> : vector<16xf32>
    %440 = vector.multi_reduction <add>, %439, %cst_186 [1] : vector<16x32xf32> to vector<16xf32>
    %441 = vector.shape_cast %440 : vector<16xf32> to vector<16x1xf32>
    %cst_187 = arith.constant 3.200000e+01 : f32
    %442 = vector.broadcast %cst_187 : f32 to vector<16x1xf32>
    %443 = arith.divf %441, %442 : vector<16x1xf32>
    %444 = vector.broadcast %443 : vector<16x1xf32> to vector<16x32xf32>
    %445 = arith.subf %439, %444 : vector<16x32xf32>
    %446 = arith.mulf %445, %445 : vector<16x32xf32>
    %cst_188 = arith.constant dense<0.000000e+00> : vector<16xf32>
    %447 = vector.multi_reduction <add>, %446, %cst_188 [1] : vector<16x32xf32> to vector<16xf32>
    %448 = vector.shape_cast %447 : vector<16xf32> to vector<16x1xf32>
    %cst_189 = arith.constant 3.200000e+01 : f32
    %449 = vector.broadcast %cst_189 : f32 to vector<16x1xf32>
    %450 = arith.divf %448, %449 : vector<16x1xf32>
    %451 = vector.broadcast %443 : vector<16x1xf32> to vector<16x32xf32>
    %452 = arith.subf %439, %451 : vector<16x32xf32>
    %cst_190 = arith.constant 9.99999974E-6 : f32
    %453 = vector.broadcast %cst_190 : f32 to vector<16x1xf32>
    %454 = arith.addf %450, %453 : vector<16x1xf32>
    %455 = math.rsqrt %454 : vector<16x1xf32>
    %456 = vector.broadcast %455 : vector<16x1xf32> to vector<16x32xf32>
    %457 = arith.mulf %452, %456 : vector<16x32xf32>
    %458 = vector.broadcast %256 : vector<1x32xf32> to vector<16x32xf32>
    %459 = arith.mulf %457, %458 : vector<16x32xf32>
    %460 = vector.broadcast %258 : vector<1x32xf32> to vector<16x32xf32>
    %461 = arith.addf %459, %460 : vector<16x32xf32>
    %cst_191 = arith.constant dense<0.000000e+00> : vector<16x64xf32>
    %462 = tpu.matmul %461, %260, %cst_191 {dimension_numbers = #tpu.dot_dimension_numbers<[1], [0], [0], [1], [0, 0, 1, 1], [], []>} : vector<16x32xf32>, vector<32x64xf32>, vector<16x64xf32> -> vector<16x64xf32>
    %463 = vector.broadcast %262 : vector<1x64xf32> to vector<16x64xf32>
    %464 = arith.addf %462, %463 : vector<16x64xf32>
    %cst_192 = arith.constant 0.000000e+00 : f32
    %465 = vector.broadcast %cst_192 : f32 to vector<16x64xf32>
    %466 = arith.maximumf %464, %465 : vector<16x64xf32>
    %cst_193 = arith.constant dense<0.000000e+00> : vector<16x32xf32>
    %467 = tpu.matmul %466, %264, %cst_193 {dimension_numbers = #tpu.dot_dimension_numbers<[1], [0], [0], [1], [0, 0, 1, 1], [], []>} : vector<16x64xf32>, vector<64x32xf32>, vector<16x32xf32> -> vector<16x32xf32>
    %468 = vector.broadcast %266 : vector<1x32xf32> to vector<16x32xf32>
    %469 = arith.addf %467, %468 : vector<16x32xf32>
    %470 = arith.addf %461, %469 : vector<16x32xf32>
    %cst_194 = arith.constant dense<0.000000e+00> : vector<16xf32>
    %471 = vector.multi_reduction <add>, %470, %cst_194 [1] : vector<16x32xf32> to vector<16xf32>
    %472 = vector.shape_cast %471 : vector<16xf32> to vector<16x1xf32>
    %cst_195 = arith.constant 3.200000e+01 : f32
    %473 = vector.broadcast %cst_195 : f32 to vector<16x1xf32>
    %474 = arith.divf %472, %473 : vector<16x1xf32>
    %475 = vector.broadcast %474 : vector<16x1xf32> to vector<16x32xf32>
    %476 = arith.subf %470, %475 : vector<16x32xf32>
    %477 = arith.mulf %476, %476 : vector<16x32xf32>
    %cst_196 = arith.constant dense<0.000000e+00> : vector<16xf32>
    %478 = vector.multi_reduction <add>, %477, %cst_196 [1] : vector<16x32xf32> to vector<16xf32>
    %479 = vector.shape_cast %478 : vector<16xf32> to vector<16x1xf32>
    %cst_197 = arith.constant 3.200000e+01 : f32
    %480 = vector.broadcast %cst_197 : f32 to vector<16x1xf32>
    %481 = arith.divf %479, %480 : vector<16x1xf32>
    %482 = vector.broadcast %474 : vector<16x1xf32> to vector<16x32xf32>
    %483 = arith.subf %470, %482 : vector<16x32xf32>
    %cst_198 = arith.constant 9.99999974E-6 : f32
    %484 = vector.broadcast %cst_198 : f32 to vector<16x1xf32>
    %485 = arith.addf %481, %484 : vector<16x1xf32>
    %486 = math.rsqrt %485 : vector<16x1xf32>
    %487 = vector.broadcast %486 : vector<16x1xf32> to vector<16x32xf32>
    %488 = arith.mulf %483, %487 : vector<16x32xf32>
    %489 = vector.broadcast %268 : vector<1x32xf32> to vector<16x32xf32>
    %490 = arith.mulf %488, %489 : vector<16x32xf32>
    %491 = vector.broadcast %270 : vector<1x32xf32> to vector<16x32xf32>
    %492 = arith.addf %490, %491 : vector<16x32xf32>
    %c0_199 = arith.constant 0 : index
    %c0_200 = arith.constant 0 : index
    %493 = vector.load %arg13[%c0_199, %c0_200] : memref<16x32xf32, #tpu.memory_space<vmem>>, vector<16x32xf32>
    tpu.vector_store %arg13[%c0_199, %c0_200], %492 {strides = array<i32>} : memref<16x32xf32, #tpu.memory_space<vmem>>, vector<16x32xf32>,
    return
  }
}

</mosaic_0001>

<bundles_post_ra>
// kernel: tpu_custom_call.1
= control target key start
LH: loop header
LB: loop body
LE: loop exit
PB: predicated region body
PF: predicated region fallthrough
CT: control target
= control target key end

     0   :  { %18 = vsyncpa [#allocation3], 0  ;;  %s6119_s0 = inlined_call_operand.hbm [shape: f32[16,32], index: 0, kind: input, shape index: {}]   ;;  %s6120_s1 = inlined_call_operand.vmem [shape: f32[2,32,96], index: 1, kind: input, shape index: {}]   ;;  %s6121_s2 = inlined_call_operand.vmem [shape: f32[2,1,96], index: 2, kind: input, shape index: {}]   ;;  %s6122_s3 = inlined_call_operand.vmem [shape: f32[2,32,32], index: 3, kind: input, shape index: {}]   ;;  %s6123_s4 = inlined_call_operand.vmem [shape: f32[2,1,32], index: 4, kind: input, shape index: {}]   ;;  %s6124_s5 = inlined_call_operand.vmem [shape: f32[2,1,32], index: 5, kind: input, shape index: {}]   ;;  %s6125_s6 = inlined_call_operand.vmem [shape: f32[2,1,32], index: 6, kind: input, shape index: {}]   ;;  %s6126_s7 = inlined_call_operand.vmem [shape: f32[2,32,64], index: 7, kind: input, shape index: {}]   ;;  %s6127_s8 = inlined_call_operand.vmem [shape: f32[2,1,64], index: 8, kind: input, shape index: {}]   ;;  %s6128_s9 = inlined_call_operand.vmem [shape: f32[2,64,32], index: 9, kind: input, shape index: {}]   ;;  %s6129_s10 = inlined_call_operand.vmem [shape: f32[2,1,32], index: 10, kind: input, shape index: {}]   ;;  %s6130_s11 = inlined_call_operand.vmem [shape: f32[2,1,32], index: 11, kind: input, shape index: {}]   ;;  %s6131_s12 = inlined_call_operand.vmem [shape: f32[2,1,32], index: 12, kind: input, shape index: {}]   ;;  %s6132_s13 = inlined_call_operand.hbm [shape: f32[16,32], index: 13, kind: output, shape index: {}]  }
   0x1   :  { %19 = vsyncpa [#allocation4], 0  ;;  %s5421_s25 = smov [#allocation2]  }
   0x2   :  { %s25_s26 = sshll.u32 %s5421_s25, 4  ;;  %s26_s26 = int_to_ptr.vmem [resolvable:$true] %s25_s26 }
   0x3   :  { %s5385_s27 = scalar_lea.vmem %s26_s26, 256  ;;  %p5390_p1 = scmp.lt.s32.totalorder %s26_s26, %s26_s26 }
   0x4   :  { %p5386_p0 = scmp.ne.s32.totalorder %s26_s26, %s5385_s27  ;;  %p5391_p2 = scmp.lt.s32.totalorder %s5385_s27, %s5385_s27 }
   0x6   :  { %p5392_p3 = por %p5391_p2, %p5390_p1 }
   0x8   :  { %p5393_p4 = pnand %p5392_p3, %p5386_p0 }
   0xa   :  { %5396 = shalt.err (!%p5393_p4)
}
   0xb   :  { %s6133_s28 = smov 128   ;;  %s6134_s29 = smov 8  }
   0xc   :  { %31 = dma.hbm_to_vmem [thread:$0]  %s6119_s0, 256, %s26_s26, [#allocation3], %s6133_s28, %s6133_s28, %s6134_s29  }
   0xd   :  { %5417 = dma.done.wait [#allocation3], 256  }
   0xe   :  { %5418 = vsyncadd [#allocation3], 4294967040  ;;  %vm95_vm0 = vcmask 261120   ;;  %v64_v0 = vld [vmem:[%s6120_s1 + $0x18] sm:$0xff]  ;;  %v63_v1 = vld [vmem:[%s6120_s1 + $0x10] sm:$0xff]  ;;  %v5424_v6 = vmov 0.0  }
   0xf   :  { %4958 = vmatprep.subr.mxu0 %v64_v0  ;;  %v5520_v2 = vld [vmem:[#allocation2] sm:$0xff]  ;;  %v62_v3 = vld [vmem:[%s6120_s1 + $0x8] sm:$0xff]  ;;  %4974 = vmatprep.subr.mxu1 %v5424_v6  ;;  %vm5425_vm1 = vmmov 0   ;;  %s5426_s24 = smov 120   ;;  %s5427_s25 = smov 96   ;;  %vm180_vm2 = vcmask 64512  }
  0x10   :  { %4959 = vmatpush3.msra.mxu0 %v64_v0  ;;  %4966 = vmatprep.mubr.msk.f32.mxu0 %vm95_vm0, %v5520_v2  ;;  %v61_v4 = vld [vmem:[%s6120_s1] sm:$0xff]  ;;  %v5530_v5 = vld [vmem:[#allocation2 + $0x8] sm:$0xff]  ;;  %s5428_s26 = smov 88   ;;  %s5429_s27 = smov 56   ;;  %vm2240_vm3 = vcmask 523264  }
  0x11   :  { %4960 = vmatprep.subr.mxu0 %v63_v1  ;;  %4976 = vmatprep.mubr.msk.f32.mxu1 %vm5425_vm1, %v5424_v6  ;;  %v4698_v7 = vld [vmem:[%s6121_s2] ss:$0 sm:$0xff]  ;;  %s5430_s30 = smov 64   ;;  %s5431_s14 = smov 80   ;;  %v5593_v42 = vld [vmem:[%s6122_s3 + $0x8] sm:$0xff] }
  0x12   :  { %4961 = vmatpush3.msra.mxu0 %v63_v1  ;;  %s5432_s15 = smov 112   ;;  %v5587_v41 = vld [vmem:[%s6122_s3] sm:$0xff]  ;;  %s5433_s20 = smov 72  }
  0x13   :  { %4962 = vmatprep.subr.mxu0 %v62_v3  ;;  %s5434_s0 = smov 104   ;;  %s5435_s21 = smov 48  }
  0x14   :  { %4963 = vmatpush3.msra.mxu0 %v62_v3  ;;  %s6135_s16 = smov 40   ;;  %s6137_s18 = smov 40  }
  0x15   :  { %4964 = vmatprep.subr.mxu0 %v61_v4 }
  0x16   :  { %4965 = vmatpush3.msra.mxu0 %v61_v4 }
  0x17   :  { %4967 = vmatmul.mubr.msk.f32.vlgmr.msra.gmra.mxu0 %vm95_vm0, %v5530_v5  ;;  %4969 = vmatprep.subr.mxu0 %v5424_v6 }
  0x18   :  { %4971 = vmatprep.mubr.msk.f32.mxu0 %vm5425_vm1, %v5424_v6 }
  0xd7   :  { %v4968_v8 = vpop.f32.mrf.mxu0 }
  0xd8   :  { %v5543_v9 = vadd.f32 %v4968_v8, %v4698_v7  ;;  %v5633_v8 = vld [vmem:[%s6122_s3 + $0x10] sm:$0xff] }
  0xd9   :  { %v168_v10 = vpop.f32.mrf.mxu0 }
  0xda   :  { %v5545_v11 = vadd.f32 %v4698_v7, %v168_v10 }
  0xdc   :  { %343 = vrot.lane.b32.xlu1 %v5545_v11, %s5426_s24  ;;  %178 = vrot.lane.b32.xlu0 %v5545_v11, %s5427_s25 }
  0xe0   :  { %345 = vrot.lane.b32.xlu0 %v5545_v11, %s5428_s26 }
 0x14e   :  { %v179_v12 = vpop.permute.xlu0 %178  ;;  %v344_v14 = vpop.permute.xlu1 %343 }
 0x14f   :  { %4970 = vmatpush3.xpose.msk.msra.mxu0 %vm180_vm2, %v179_v12 }
 0x150   :  { %4979 = vmatprep.subr.mxu0 %v5424_v6 }
 0x152   :  { %4972 = vmatmul.mubr.msk.f32.vlgmr.msra.gmra.mxu0 %vm180_vm2, %v5545_v11  ;;  %v346_v13 = vpop.permute.xlu0 %345 }
 0x153   :  { %4980 = vmatpush3.xpose.msk.msra.mxu0 %vm180_vm2, %v346_v13  ;;  %4981 = vmatprep.mubr.msk.f32.mxu0 %vm5425_vm1, %v5424_v6 }
 0x154   :  { %4989 = vmatprep.subr.mxu0 %v5424_v6 }
 0x156   :  { %4982 = vmatmul.mubr.msk.f32.vlgmr.msra.gmra.mxu0 %vm180_vm2, %v344_v14 }
 0x157   :  { %4991 = vmatprep.mubr.msk.f32.mxu0 %vm5425_vm1, %v5424_v6  ;;  %4990 = vmatpush3.msra.mxu0 %v5593_v42 }
 0x158   :  { %4999 = vmatprep.subr.mxu0 %v5424_v6 }
 0x212   :  { %v251_v15 = vpop.f32.mrf.mxu0 }
 0x213   :  { %v255_v16 = vmul.f32 0.35355338, %v251_v15 }
 0x214   :  { %v4973_v17 = vpop.f32.mrf.mxu0 }
 0x215   :  { %v256_v18 = vsel %vm180_vm2, %v255_v16, -inf }
 0x216   :  { %257 = vmax.xlane.f32.xlu1 %v256_v18  ;;  %v417_v19 = vpop.f32.mrf.mxu0 }
 0x217   :  { %v421_v20 = vmul.f32 0.35355338, %v417_v19 }
 0x218   :  { %v4983_v21 = vpop.f32.mrf.mxu0 }
 0x219   :  { %v422_v22 = vsel %vm180_vm2, %v421_v20, -inf }
 0x21a   :  { %423 = vmax.xlane.f32.xlu0 %v422_v22 }
 0x29f   :  { %v258_v23 = vpop.xlane.xlu1 %257 }
 0x2a0   :  { %v259_v24 = vsub.f32 %v255_v16, %v258_v23 }
 0x2a2   :  { %v260_v25 = vmul.f32 1.442695, %v259_v24 }
 0x2a3   :  { %v424_v26 = vpop.xlane.xlu0 %423 }
 0x2a4   :  { %5297 = vpow2.f32 %v260_v25  ;;  %v425_v27 = vsub.f32 %v421_v20, %v424_v26 }
 0x2a6   :  { %v426_v28 = vmul.f32 1.442695, %v425_v27 }
 0x2a8   :  { %5299 = vpow2.f32 %v426_v28 }
 0x2b1   :  { %v5298_v29 = vpop.eup %5297 }
 0x2b2   :  { %v262_v30 = vsel %vm180_vm2, %v5298_v29, 0.0 }
 0x2b3   :  { %263 = vadd.xlane.f32.xlu0 %v262_v30 }
 0x2b5   :  { %v5300_v31 = vpop.eup %5299 }
 0x2b6   :  { %v428_v32 = vsel %vm180_vm2, %v5300_v31, 0.0 }
 0x2b7   :  { %429 = vadd.xlane.f32.xlu1 %v428_v32 }
 0x2c8   :  { %433 = vrot.lane.b32.xlu1 %v5545_v11, %s5429_s27 }
 0x2c9   :  { %267 = vrot.lane.b32.xlu0 %v5545_v11, %s5430_s30 }
 0x2cc   :  { %657 = vrot.lane.b32.xlu1 %v5545_v11, %s5431_s14 }
 0x2cd   :  { %655 = vrot.lane.b32.xlu0 %v5545_v11, %s5432_s15 }
 0x33c   :  { %v264_v33 = vpop.xlane.xlu0 %263 }
 0x33d   :  { %5301 = vrcp.f32 %v264_v33 }
 0x340   :  { %v430_v34 = vpop.xlane.xlu1 %429  ;;  %v268_v35 = vpop.permute.xlu0 %267 }
 0x341   :  { %5303 = vrcp.f32 %v430_v34  ;;  %4975 = vmatpush3.msra.mxu1 %v268_v35 }
 0x342   :  { %4984 = vmatprep.subr.mxu1 %v5424_v6 }
 0x344   :  { %v434_v38 = vpop.permute.xlu1 %433  ;;  %v656_v48 = vpop.permute.xlu0 %655 }
 0x348   :  { %v658_v46 = vpop.permute.xlu1 %657 }
 0x34a   :  { %v5302_v36 = vpop.eup %5301 }
 0x34b   :  { %v266_v37 = vmul.f32 %v5302_v36, %v5298_v29 }
 0x34d   :  { %4977 = vmatmul.mubr.msk.f32.vlgmr.msra.gmra.mxu1 %vm180_vm2, %v266_v37 }
 0x34e   :  { %v5304_v39 = vpop.eup %5303  ;;  %4985 = vmatpush3.msra.mxu1 %v434_v38  ;;  %4986 = vmatprep.mubr.msk.f32.mxu1 %vm5425_vm1, %v5424_v6 }
 0x34f   :  { %v432_v40 = vmul.f32 %v5304_v39, %v5300_v31  ;;  %4994 = vmatprep.subr.mxu1 %v5424_v6  ;;  %v5669_v31 = vld [vmem:[%s6122_s3 + $0x18] sm:$0xff] }
 0x351   :  { %4987 = vmatmul.mubr.msk.f32.vlgmr.msra.gmra.mxu1 %vm180_vm2, %v432_v40 }
 0x352   :  { %4996 = vmatprep.mubr.msk.f32.mxu1 %vm5425_vm1, %v5424_v6  ;;  %4995 = vmatpush3.msra.mxu1 %v5587_v41 }
 0x353   :  { %5004 = vmatprep.subr.mxu1 %v5424_v6 }
 0x40d   :  { %v339_v43 = vpop.f32.mrf.mxu1 }
 0x40e   :  { %4997 = vmatmul.mubr.msk.f32.vlgmr.msra.gmra.mxu1 %vm180_vm2, %v339_v43 }
 0x40f   :  { %v4978_v44 = vpop.f32.mrf.mxu1  ;;  %5006 = vmatprep.mubr.msk.f32.mxu1 %vm5425_vm1, %v5424_v6 }
 0x411   :  { %v505_v45 = vpop.f32.mrf.mxu1 }
 0x412   :  { %4992 = vmatmul.mubr.msk.f32.vlgmr.msra.gmra.mxu0 %vm180_vm2, %v505_v45 }
 0x413   :  { %5000 = vmatpush3.xpose.msk.msra.mxu0 %vm180_vm2, %v658_v46  ;;  %v4988_v47 = vpop.f32.mrf.mxu1  ;;  %5001 = vmatprep.mubr.msk.f32.mxu0 %vm5425_vm1, %v5424_v6 }
 0x414   :  { %5009 = vmatprep.subr.mxu0 %v5424_v6 }
 0x416   :  { %5002 = vmatmul.mubr.msk.f32.vlgmr.msra.gmra.mxu0 %vm180_vm2, %v656_v48 }
 0x417   :  { %5011 = vmatprep.mubr.msk.f32.mxu0 %vm5425_vm1, %v5424_v6  ;;  %5010 = vmatpush3.msra.mxu0 %v5633_v8 }
 0x418   :  { %5019 = vmatprep.subr.mxu0 %v5424_v6 }
 0x4ce   :  { %v651_v49 = vpop.f32.mrf.mxu1 }
 0x4d0   :  { %v4998_v50 = vpop.f32.mrf.mxu1 }
 0x4d2   :  { %v578_v51 = vpop.f32.mrf.mxu0 }
 0x4d3   :  { %v5609_v52 = vadd.f32 %v651_v49, %v578_v51 }
 0x4d4   :  { %v4993_v53 = vpop.f32.mrf.mxu0 }
 0x4d6   :  { %v729_v54 = vpop.f32.mrf.mxu0 }
 0x4d7   :  { %v733_v55 = vmul.f32 0.35355338, %v729_v54 }
 0x4d8   :  { %v5003_v56 = vpop.f32.mrf.mxu0 }
 0x4d9   :  { %v734_v57 = vsel %vm180_vm2, %v733_v55, -inf }
 0x4da   :  { %735 = vmax.xlane.f32.xlu1 %v734_v57 }
 0x4eb   :  { %897 = vrot.lane.b32.xlu1 %v5545_v11, %s5433_s20 }
 0x4ef   :  { %895 = vrot.lane.b32.xlu1 %v5545_v11, %s5434_s0 }
 0x4f3   :  { %1136 = vrot.lane.b32.xlu1 %v5543_v9, %s5427_s25 }
 0x563   :  { %v736_v58 = vpop.xlane.xlu1 %735 }
 0x564   :  { %v737_v59 = vsub.f32 %v733_v55, %v736_v58 }
 0x566   :  { %v738_v60 = vmul.f32 1.442695, %v737_v59 }
 0x567   :  { %v898_v3 = vpop.permute.xlu1 %897 }
 0x568   :  { %5305 = vpow2.f32 %v738_v60 }
 0x56b   :  { %v896_v7 = vpop.permute.xlu1 %895 }
 0x56f   :  { %v1137_v25 = vpop.permute.xlu1 %1136 }
 0x575   :  { %v5306_v61 = vpop.eup %5305 }
 0x576   :  { %v740_v62 = vsel %vm180_vm2, %v5306_v61, 0.0 }
 0x577   :  { %741 = vadd.xlane.f32.xlu0 %v740_v62 }
 0x58d   :  { %745 = vrot.lane.b32.xlu0 %v5545_v11, %s5435_s21 }
 0x600   :  { %v742_v63 = vpop.xlane.xlu0 %741 }
 0x601   :  { %5307 = vrcp.f32 %v742_v63 }
 0x604   :  { %v746_v0 = vpop.permute.xlu0 %745 }
 0x605   :  { %5005 = vmatpush3.msra.mxu1 %v746_v0 }
 0x606   :  { %5014 = vmatprep.subr.mxu1 %v5424_v6 }
 0x60e   :  { %v5308_v1 = vpop.eup %5307 }
 0x60f   :  { %v744_v4 = vmul.f32 %v5308_v1, %v5306_v61 }
 0x611   :  { %5007 = vmatmul.mubr.msk.f32.vlgmr.msra.gmra.mxu1 %vm180_vm2, %v744_v4 }
 0x612   :  { %5015 = vmatpush3.xpose.msk.msra.mxu1 %vm180_vm2, %v898_v3  ;;  %5016 = vmatprep.mubr.msk.f32.mxu1 %vm5425_vm1, %v5424_v6 }
 0x613   :  { %5024 = vmatprep.subr.mxu1 %v5424_v6 }
 0x615   :  { %5017 = vmatmul.mubr.msk.f32.vlgmr.msra.gmra.mxu1 %vm180_vm2, %v896_v7 }
 0x616   :  { %5026 = vmatprep.mubr.msk.f32.mxu1 %vm5425_vm1, %v5424_v6  ;;  %5025 = vmatpush3.msra.mxu1 %v5669_v31 }
 0x617   :  { %5034 = vmatprep.subr.mxu1 %v5424_v6 }
 0x6d1   :  { %v817_v10 = vpop.f32.mrf.mxu1 }
 0x6d2   :  { %5012 = vmatmul.mubr.msk.f32.vlgmr.msra.gmra.mxu0 %vm180_vm2, %v817_v10 }
 0x6d3   :  { %v5008_v12 = vpop.f32.mrf.mxu1  ;;  %5021 = vmatprep.mubr.msk.f32.mxu0 %vm5425_vm1, %v5424_v6 }
 0x6d5   :  { %v969_v13 = vpop.f32.mrf.mxu1 }
 0x6d6   :  { %v973_v14 = vmul.f32 0.35355338, %v969_v13 }
 0x6d7   :  { %v5018_v15 = vpop.f32.mrf.mxu1 }
 0x6d8   :  { %v974_v16 = vsel %vm180_vm2, %v973_v14, -inf }
 0x6d9   :  { %975 = vmax.xlane.f32.xlu0 %v974_v16 }
 0x6ef   :  { %985 = vrot.lane.b32.xlu0 %v5545_v11, %s6135_s16 }
 0x6f3   :  { %1302 = vrot.lane.b32.xlu0 %v5543_v9, %s5428_s26 }
 0x762   :  { %v976_v17 = vpop.xlane.xlu0 %975 }
 0x763   :  { %v977_v18 = vsub.f32 %v973_v14, %v976_v17 }
 0x765   :  { %v978_v19 = vmul.f32 1.442695, %v977_v18 }
 0x766   :  { %v986_v20 = vpop.permute.xlu0 %985 }
 0x767   :  { %5309 = vpow2.f32 %v978_v19  ;;  %5020 = vmatpush3.msra.mxu0 %v986_v20 }
 0x768   :  { %5029 = vmatprep.subr.mxu0 %v5424_v6 }
 0x76a   :  { %v1303_v29 = vpop.permute.xlu0 %1302 }
 0x774   :  { %v5310_v21 = vpop.eup %5309 }
 0x775   :  { %v980_v22 = vsel %vm180_vm2, %v5310_v21, 0.0 }
 0x776   :  { %981 = vadd.xlane.f32.xlu1 %v980_v22 }
 0x787   :  { %1300 = vrot.lane.b32.xlu1 %v5543_v9, %s5426_s24 }
 0x792   :  { %v890_v23 = vpop.f32.mrf.mxu0 }
 0x793   :  { %v894_v11 = vadd.f32 %v890_v23, %v5609_v52 }
 0x794   :  { %v5013_v24 = vpop.f32.mrf.mxu0 }
 0x7ff   :  { %v982_v26 = vpop.xlane.xlu1 %981 }
 0x800   :  { %5311 = vrcp.f32 %v982_v26 }
 0x803   :  { %v1301_v30 = vpop.permute.xlu1 %1300 }
 0x80d   :  { %v5312_v27 = vpop.eup %5311 }
 0x80e   :  { %v984_v28 = vmul.f32 %v5312_v27, %v5310_v21 }
 0x810   :  { %5022 = vmatmul.mubr.msk.f32.vlgmr.msra.gmra.mxu0 %vm180_vm2, %v984_v28 }
 0x811   :  { %5030 = vmatpush3.xpose.msk.msra.mxu0 %vm180_vm2, %v1137_v25  ;;  %5031 = vmatprep.mubr.msk.f32.mxu0 %vm5425_vm1, %v5424_v6 }
 0x812   :  { %5039 = vmatprep.subr.mxu0 %v5424_v6 }
 0x814   :  { %5032 = vmatmul.mubr.msk.f32.vlgmr.msra.gmra.mxu0 %vm180_vm2, %v5543_v9 }
 0x815   :  { %5040 = vmatpush3.xpose.msk.msra.mxu0 %vm180_vm2, %v1303_v29  ;;  %5041 = vmatprep.mubr.msk.f32.mxu0 %vm5425_vm1, %v5424_v6  ;;  %v4733_v29 = vld [vmem:[%s6123_s4] ss:$0 sm:$0xff] }
 0x816   :  { %5049 = vmatprep.subr.mxu0 %v5424_v6 }
 0x818   :  { %5042 = vmatmul.mubr.msk.f32.vlgmr.msra.gmra.mxu0 %vm180_vm2, %v1301_v30 }
 0x819   :  { %5050 = vmatpush3.msra.mxu0 %v5593_v42  ;;  %5051 = vmatprep.mubr.msk.f32.mxu0 %vm5425_vm1, %v5424_v6 }
 0x81a   :  { %5059 = vmatprep.subr.mxu0 %v5424_v6 }
 0x8d0   :  { %v1057_v32 = vpop.f32.mrf.mxu0 }
 0x8d1   :  { %5027 = vmatmul.mubr.msk.f32.vlgmr.msra.gmra.mxu1 %vm180_vm2, %v1057_v32 }
 0x8d2   :  { %v5023_v33 = vpop.f32.mrf.mxu0  ;;  %5036 = vmatprep.mubr.msk.f32.mxu1 %vm5425_vm1, %v5424_v6 }
 0x8d4   :  { %v1208_v34 = vpop.f32.mrf.mxu0 }
 0x8d5   :  { %v1212_v35 = vmul.f32 0.35355338, %v1208_v34 }
 0x8d6   :  { %v5033_v36 = vpop.f32.mrf.mxu0 }
 0x8d7   :  { %v1213_v37 = vsel %vm180_vm2, %v1212_v35, -inf }
 0x8d8   :  { %1214 = vmax.xlane.f32.xlu0 %v1213_v37  ;;  %v1374_v38 = vpop.f32.mrf.mxu0 }
 0x8d9   :  { %v1378_v39 = vmul.f32 0.35355338, %v1374_v38 }
 0x8da   :  { %v5043_v40 = vpop.f32.mrf.mxu0 }
 0x8db   :  { %v1379_v42 = vsel %vm180_vm2, %v1378_v39, -inf }
 0x8dc   :  { %1380 = vmax.xlane.f32.xlu1 %v1379_v42 }
 0x8ed   :  { %1224 = vrot.lane.b32.xlu1 %v5543_v9, %s5430_s30 }
 0x8f1   :  { %1614 = vrot.lane.b32.xlu1 %v5543_v9, %s5431_s14 }
 0x8f5   :  { %1612 = vrot.lane.b32.xlu1 %v5543_v9, %s5432_s15 }
 0x961   :  { %v1215_v43 = vpop.xlane.xlu0 %1214 }
 0x962   :  { %v1216_v44 = vsub.f32 %v1212_v35, %v1215_v43 }
 0x964   :  { %v1217_v45 = vmul.f32 1.442695, %v1216_v44 }
 0x965   :  { %v1381_v46 = vpop.xlane.xlu1 %1380 }
 0x966   :  { %5313 = vpow2.f32 %v1217_v45  ;;  %v1382_v47 = vsub.f32 %v1378_v39, %v1381_v46 }
 0x968   :  { %v1383_v48 = vmul.f32 1.442695, %v1382_v47 }
 0x969   :  { %v1225_v49 = vpop.permute.xlu1 %1224 }
 0x96a   :  { %5315 = vpow2.f32 %v1383_v48  ;;  %5035 = vmatpush3.msra.mxu1 %v1225_v49 }
 0x96b   :  { %5044 = vmatprep.subr.mxu1 %v5424_v6 }
 0x96d   :  { %v1615_v1 = vpop.permute.xlu1 %1614 }
 0x973   :  { %v5314_v50 = vpop.eup %5313 }
 0x974   :  { %v1219_v51 = vsel %vm180_vm2, %v5314_v50, 0.0 }
 0x975   :  { %1220 = vadd.xlane.f32.xlu0 %v1219_v51 }
 0x977   :  { %v5316_v52 = vpop.eup %5315 }
 0x978   :  { %v1385_v53 = vsel %vm180_vm2, %v5316_v52, 0.0 }
 0x979   :  { %1386 = vadd.xlane.f32.xlu0 %v1385_v53 }
 0x98f   :  { %1390 = vrot.lane.b32.xlu0 %v5543_v9, %s5429_s27 }
 0x991   :  { %v1130_v54 = vpop.f32.mrf.mxu1 }
 0x992   :  { %v5689_v55 = vadd.f32 %v1130_v54, %v894_v11 }
 0x993   :  { %v5028_v56 = vpop.f32.mrf.mxu1 }
 0x994   :  { %v2098_v33 = vadd.f32 %v4733_v29, %v5689_v55 }
 0x996   :  { %v2100_v37 = vadd.f32 %v2098_v33, %v5520_v2  ;;  %v79_v33 = vld [vmem:[%s6128_s9 + $0x8] sm:$0xff] }
 0x998   :  { %v2102_v38 = vsel %vm95_vm0, %v2100_v37, 0.0 }
 0x9fe   :  { %v1221_v57 = vpop.xlane.xlu0 %1220 }
 0x9ff   :  { %5317 = vrcp.f32 %v1221_v57 }
 0xa02   :  { %v1387_v58 = vpop.xlane.xlu0 %1386 }
 0xa03   :  { %5319 = vrcp.f32 %v1387_v58 }
 0xa06   :  { %v1391_v61 = vpop.permute.xlu0 %1390 }
 0xa0c   :  { %v5318_v59 = vpop.eup %5317 }
 0xa0d   :  { %v1223_v60 = vmul.f32 %v5318_v59, %v5314_v50 }
 0xa0f   :  { %5037 = vmatmul.mubr.msk.f32.vlgmr.msra.gmra.mxu1 %vm180_vm2, %v1223_v60 }
 0xa10   :  { %v5320_v62 = vpop.eup %5319  ;;  %5045 = vmatpush3.msra.mxu1 %v1391_v61  ;;  %5046 = vmatprep.mubr.msk.f32.mxu1 %vm5425_vm1, %v5424_v6 }
 0xa11   :  { %v1389_v63 = vmul.f32 %v5320_v62, %v5316_v52  ;;  %5054 = vmatprep.subr.mxu1 %v5424_v6 }
 0xa13   :  { %5047 = vmatmul.mubr.msk.f32.vlgmr.msra.gmra.mxu1 %vm180_vm2, %v1389_v63 }
 0xa14   :  { %5055 = vmatpush3.msra.mxu1 %v5587_v41  ;;  %5056 = vmatprep.mubr.msk.f32.mxu1 %vm5425_vm1, %v5424_v6  ;;  %v1613_v41 = vpop.permute.xlu1 %1612 }
 0xa15   :  { %5064 = vmatprep.subr.mxu1 %v5424_v6 }
 0xacf   :  { %v1296_v0 = vpop.f32.mrf.mxu1 }
 0xad0   :  { %5057 = vmatmul.mubr.msk.f32.vlgmr.msra.gmra.mxu1 %vm180_vm2, %v1296_v0 }
 0xad1   :  { %v5038_v3 = vpop.f32.mrf.mxu1  ;;  %5066 = vmatprep.mubr.msk.f32.mxu1 %vm5425_vm1, %v5424_v6 }
 0xad3   :  { %v1462_v4 = vpop.f32.mrf.mxu1 }
 0xad4   :  { %5052 = vmatmul.mubr.msk.f32.vlgmr.msra.gmra.mxu0 %vm180_vm2, %v1462_v4 }
 0xad5   :  { %5060 = vmatpush3.xpose.msk.msra.mxu0 %vm180_vm2, %v1615_v1  ;;  %v5048_v7 = vpop.f32.mrf.mxu1  ;;  %5061 = vmatprep.mubr.msk.f32.mxu0 %vm5425_vm1, %v5424_v6 }
 0xad6   :  { %5069 = vmatprep.subr.mxu0 %v5424_v6 }
 0xad8   :  { %5062 = vmatmul.mubr.msk.f32.vlgmr.msra.gmra.mxu0 %vm180_vm2, %v1613_v41 }
 0xad9   :  { %5070 = vmatpush3.msra.mxu0 %v5633_v8  ;;  %5071 = vmatprep.mubr.msk.f32.mxu0 %vm5425_vm1, %v5424_v6 }
 0xada   :  { %5079 = vmatprep.subr.mxu0 %v5424_v6 }
 0xb90   :  { %v1608_v10 = vpop.f32.mrf.mxu1 }
 0xb92   :  { %v5058_v12 = vpop.f32.mrf.mxu1 }
 0xb94   :  { %v1535_v13 = vpop.f32.mrf.mxu0 }
 0xb95   :  { %v1609_v14 = vadd.f32 %v1608_v10, %v1535_v13 }
 0xb96   :  { %v5053_v15 = vpop.f32.mrf.mxu0 }
 0xb98   :  { %v1686_v16 = vpop.f32.mrf.mxu0 }
 0xb99   :  { %v1690_v17 = vmul.f32 0.35355338, %v1686_v16 }
 0xb9a   :  { %v5063_v18 = vpop.f32.mrf.mxu0 }
 0xb9b   :  { %v1691_v19 = vsel %vm180_vm2, %v1690_v17, -inf  ;;  %v75_v18 = vld [vmem:[%s6126_s7 + $0x10] sm:$0xff] }
 0xb9c   :  { %1692 = vmax.xlane.f32.xlu0 %v1691_v19  ;;  %v74_v19 = vld [vmem:[%s6126_s7 + $0x8] sm:$0xff] }
 0xbb2   :  { %1702 = vrot.lane.b32.xlu0 %v5543_v9, %s5435_s21 }
 0xbb6   :  { %1852 = vrot.lane.b32.xlu0 %v5543_v9, %s5434_s0 }
 0xc25   :  { %v1693_v8 = vpop.xlane.xlu0 %1692 }
 0xc26   :  { %v1694_v20 = vsub.f32 %v1690_v17, %v1693_v8  ;;  %v76_v17 = vld [vmem:[%s6126_s7 + $0x18] sm:$0xff]  ;;  %v73_v8 = vld [vmem:[%s6126_s7] sm:$0xff] }
 0xc28   :  { %v1695_v21 = vmul.f32 1.442695, %v1694_v20  ;;  %v85_v20 = vld [vmem:[%s6128_s9 + $0x38] sm:$0xff] }
 0xc29   :  { %v1703_v22 = vpop.permute.xlu0 %1702 }
 0xc2a   :  { %5321 = vpow2.f32 %v1695_v21  ;;  %5065 = vmatpush3.msra.mxu1 %v1703_v22  ;;  %v84_v21 = vld [vmem:[%s6128_s9 + $0x30] sm:$0xff]  ;;  %v83_v22 = vld [vmem:[%s6128_s9 + $0x28] sm:$0xff] }
 0xc2b   :  { %5074 = vmatprep.subr.mxu1 %v5424_v6 }
 0xc2d   :  { %v1853_v28 = vpop.permute.xlu0 %1852 }
 0xc37   :  { %v5322_v23 = vpop.eup %5321 }
 0xc38   :  { %v1697_v11 = vsel %vm180_vm2, %v5322_v23, 0.0 }
 0xc39   :  { %1698 = vadd.xlane.f32.xlu1 %v1697_v11 }
 0xc4a   :  { %1854 = vrot.lane.b32.xlu1 %v5543_v9, %s5433_s20 }
 0xcc2   :  { %v1699_v24 = vpop.xlane.xlu1 %1698 }
 0xcc3   :  { %5323 = vrcp.f32 %v1699_v24 }
 0xcc6   :  { %v1855_v27 = vpop.permute.xlu1 %1854 }
 0xcd0   :  { %v5324_v25 = vpop.eup %5323 }
 0xcd1   :  { %v1701_v26 = vmul.f32 %v5324_v25, %v5322_v23  ;;  %v82_v23 = vld [vmem:[%s6128_s9 + $0x20] sm:$0xff] }
 0xcd3   :  { %5067 = vmatmul.mubr.msk.f32.vlgmr.msra.gmra.mxu1 %vm180_vm2, %v1701_v26 }
 0xcd4   :  { %5075 = vmatpush3.xpose.msk.msra.mxu1 %vm180_vm2, %v1855_v27  ;;  %5076 = vmatprep.mubr.msk.f32.mxu1 %vm5425_vm1, %v5424_v6 }
 0xcd5   :  { %5084 = vmatprep.subr.mxu1 %v5424_v6 }
 0xcd7   :  { %5077 = vmatmul.mubr.msk.f32.vlgmr.msra.gmra.mxu1 %vm180_vm2, %v1853_v28 }
 0xcd8   :  { %5085 = vmatpush3.msra.mxu1 %v5669_v31  ;;  %5086 = vmatprep.mubr.msk.f32.mxu1 %vm5425_vm1, %v5424_v6 }
 0xcd9   :  { %5100 = vmatprep.subr.mxu1 %v85_v20 }
 0xd93   :  { %v1774_v30 = vpop.f32.mrf.mxu1 }
 0xd94   :  { %5072 = vmatmul.mubr.msk.f32.vlgmr.msra.gmra.mxu0 %vm180_vm2, %v1774_v30  ;;  %v81_v30 = vld [vmem:[%s6128_s9 + $0x18] sm:$0xff] }
 0xd95   :  { %v5068_v32 = vpop.f32.mrf.mxu1  ;;  %5081 = vmatprep.mubr.msk.f32.mxu0 %vm5425_vm1, %v5424_v6 }
 0xd96   :  { %v80_v32 = vld [vmem:[%s6128_s9 + $0x10] sm:$0xff] }
 0xd97   :  { %v1926_v34 = vpop.f32.mrf.mxu1 }
 0xd98   :  { %v1930_v35 = vmul.f32 0.35355338, %v1926_v34  ;;  %v78_v34 = vld [vmem:[%s6128_s9] sm:$0xff] }
 0xd99   :  { %v5078_v36 = vpop.f32.mrf.mxu1 }
 0xd9a   :  { %v1931_v31 = vsel %vm180_vm2, %v1930_v35, -inf }
 0xd9b   :  { %1932 = vmax.xlane.f32.xlu1 %v1931_v31 }
 0xd9f   :  { %2103 = vadd.xlane.f32.xlu1 %v2102_v38 }
 0xe24   :  { %v1933_v39 = vpop.xlane.xlu1 %1932 }
 0xe25   :  { %v1934_v40 = vsub.f32 %v1930_v35, %v1933_v39  ;;  %v4736_v35 = vld [vmem:[%s6127_s8] ss:$0 sm:$0xff] }
 0xe27   :  { %v1935_v42 = vmul.f32 1.442695, %v1934_v40 }
 0xe28   :  { %v2104_v53 = vpop.xlane.xlu1 %2103 }
 0xe29   :  { %5325 = vpow2.f32 %v1935_v42  ;;  %v2109_v54 = vmul.f32 0.03125, %v2104_v53 }
 0xe2b   :  { %v2111_v57 = vsub.f32 %v2100_v37, %v2109_v54 }
 0xe2d   :  { %v2113_v61 = vmul.f32 %v2111_v57, %v2111_v57 }
 0xe2f   :  { %v2115_v62 = vsel %vm95_vm0, %v2113_v61, 0.0  ;;  %v4745_v61 = vld [vmem:[%s6120_s1 + $0x28] sm:$0xff] }
 0xe36   :  { %v5326_v43 = vpop.eup %5325 }
 0xe37   :  { %v1937_v44 = vsel %vm180_vm2, %v5326_v43, 0.0 }
 0xe38   :  { %1938 = vadd.xlane.f32.xlu0 %v1937_v44 }
 0xe4e   :  { %1942 = vrot.lane.b32.xlu0 %v5543_v9, %s6135_s16 }
 0xe54   :  { %v1847_v45 = vpop.f32.mrf.mxu0 }
 0xe55   :  { %v1851_v46 = vadd.f32 %v1847_v45, %v1609_v14  ;;  %v4735_v14 = vld [vmem:[%s6125_s6] ss:$0 sm:$0xff] }
 0xe56   :  { %v5073_v47 = vpop.f32.mrf.mxu0 }
 0xec1   :  { %v1939_v48 = vpop.xlane.xlu0 %1938 }
 0xec2   :  { %5327 = vrcp.f32 %v1939_v48 }
 0xec5   :  { %v1943_v2 = vpop.permute.xlu0 %1942 }
 0xec6   :  { %5080 = vmatpush3.msra.mxu0 %v1943_v2 }
 0xec7   :  { %5089 = vmatprep.subr.mxu0 %v76_v17 }
 0xecf   :  { %v5328_v49 = vpop.eup %5327 }
 0xed0   :  { %v1941_v50 = vmul.f32 %v5328_v49, %v5326_v43  ;;  %v4739_v43 = vld [vmem:[%s6129_s10] ss:$0 sm:$0xff] }
 0xed2   :  { %5082 = vmatmul.mubr.msk.f32.vlgmr.msra.gmra.mxu0 %vm180_vm2, %v1941_v50 }
 0xed3   :  { %5090 = vmatpush3.msra.mxu0 %v76_v17 }
 0xed4   :  { %5091 = vmatprep.subr.mxu0 %v75_v18 }
 0xed5   :  { %5092 = vmatpush3.msra.mxu0 %v75_v18 }
 0xed6   :  { %5093 = vmatprep.subr.mxu0 %v74_v19 }
 0xed7   :  { %5094 = vmatpush3.msra.mxu0 %v74_v19  ;;  %v4772_v19 = vld [vmem:[%s6121_s2 + $0x1] ss:$0 sm:$0xff] }
 0xed8   :  { %5095 = vmatprep.subr.mxu0 %v73_v8 }
 0xed9   :  { %5096 = vmatpush3.msra.mxu0 %v73_v8 }
 0xf92   :  { %v2014_v51 = vpop.f32.mrf.mxu0 }
 0xf93   :  { %5087 = vmatmul.mubr.msk.f32.vlgmr.msra.gmra.mxu1 %vm180_vm2, %v2014_v51 }
 0xf94   :  { %v5083_v52 = vpop.f32.mrf.mxu0  ;;  %5101 = vmatpush3.msra.mxu1 %v85_v20 }
 0xf95   :  { %5102 = vmatprep.subr.mxu1 %v84_v21 }
 0xf96   :  { %5103 = vmatpush3.msra.mxu1 %v84_v21 }
 0xf97   :  { %5104 = vmatprep.subr.mxu1 %v83_v22 }
 0xf98   :  { %5105 = vmatpush3.msra.mxu1 %v83_v22 }
 0xf99   :  { %5106 = vmatprep.subr.mxu1 %v82_v23 }
 0xf9a   :  { %5107 = vmatpush3.msra.mxu1 %v82_v23 }
 0xf9b   :  { %5108 = vmatprep.subr.mxu1 %v81_v30 }
 0xf9c   :  { %5109 = vmatpush3.msra.mxu1 %v81_v30 }
 0xf9d   :  { %5110 = vmatprep.subr.mxu1 %v80_v32 }
 0xf9e   :  { %5111 = vmatpush3.msra.mxu1 %v80_v32 }
 0xf9f   :  { %5112 = vmatprep.subr.mxu1 %v79_v33 }
 0xfa0   :  { %5113 = vmatpush3.msra.mxu1 %v79_v33 }
 0xfa1   :  { %5114 = vmatprep.subr.mxu1 %v78_v34 }
 0xfa2   :  { %5115 = vmatpush3.msra.mxu1 %v78_v34 }
 0xfa3   :  { %5135 = vmatprep.subr.mxu1 %v5424_v6 }
0x1053   :  { %v2087_v55 = vpop.f32.mrf.mxu1 }
0x1054   :  { %v2091_v56 = vadd.f32 %v2087_v55, %v1851_v46 }
0x1055   :  { %v5088_v9 = vpop.f32.mrf.mxu1 }
0x1056   :  { %v2099_v58 = vadd.f32 %v4733_v29, %v2091_v56 }
0x1058   :  { %v2101_v59 = vadd.f32 %v2099_v58, %v5530_v5  ;;  %v4734_v5 = vld [vmem:[%s6124_s5] ss:$0 sm:$0xff] }
0x105a   :  { %v2105_v60 = vsel %vm95_vm0, %v2101_v59, 0.0 }
0x105b   :  { %2106 = vadd.xlane.f32.xlu1 %v2105_v60  ;;  %v4746_v60 = vld [vmem:[%s6120_s1 + $0x30] sm:$0xff] }
0x105f   :  { %2116 = vadd.xlane.f32.xlu1 %v2115_v62  ;;  %v4744_v62 = vld [vmem:[%s6120_s1 + $0x20] sm:$0xff] }
0x10e4   :  { %v2107_v63 = vpop.xlane.xlu1 %2106 }
0x10e5   :  { %v2110_v0 = vmul.f32 0.03125, %v2107_v63 }
0x10e7   :  { %v2112_v1 = vsub.f32 %v2101_v59, %v2110_v0  ;;  %v4747_v59 = vld [vmem:[%s6120_s1 + $0x38] sm:$0xff] }
0x10e8   :  { %v2117_v3 = vpop.xlane.xlu1 %2116  ;;  %5119 = vmatprep.subr.mxu0 %v4747_v59 }
0x10e9   :  { %v2121_v4 = vmul.f32 0.03125, %v2117_v3  ;;  %v2114_v7 = vmul.f32 %v2112_v1, %v2112_v1 }
0x10eb   :  { %v2123_v41 = vadd.f32 1e-05, %v2121_v4  ;;  %v2118_v10 = vsel %vm95_vm0, %v2114_v7, 0.0 }
0x10ec   :  { %2119 = vadd.xlane.f32.xlu1 %v2118_v10  ;;  %v4742_v10 = vld [vmem:[%s6130_s11] ss:$0 sm:$0xff] }
0x10ed   :  { %5329 = vrsqrt.f32 %v2123_v41 }
0x10fa   :  { %v5330_v12 = vpop.eup %5329 }
0x10fb   :  { %v2127_v13 = vmul.f32 %v5330_v12, %v2111_v57 }
0x10fd   :  { %v2135_v15 = vmul.f32 %v4734_v5, %v2127_v13 }
0x10ff   :  { %v5756_v16 = vadd.f32 %v4735_v14, %v2135_v15 }
0x1101   :  { %5097 = vmatprep.mubr.msk.f32.mxu0 %vm95_vm0, %v5756_v16 }
0x1175   :  { %v2120_v11 = vpop.xlane.xlu1 %2119 }
0x1176   :  { %v2122_v24 = vmul.f32 0.03125, %v2120_v11 }
0x1178   :  { %v2124_v25 = vadd.f32 1e-05, %v2122_v24 }
0x117a   :  { %5331 = vrsqrt.f32 %v2124_v25 }
0x1187   :  { %v5332_v26 = vpop.eup %5331 }
0x1188   :  { %v2128_v27 = vmul.f32 %v5332_v26, %v2112_v1 }
0x118a   :  { %v2136_v28 = vmul.f32 %v4734_v5, %v2128_v27  ;;  %v4743_v5 = vld [vmem:[%s6131_s12] ss:$0 sm:$0xff] }
0x118c   :  { %v2144_v29 = vadd.f32 %v4735_v14, %v2136_v28 }
0x118e   :  { %5098 = vmatmul.mubr.msk.f32.vlgmr.msra.gmra.mxu0 %vm95_vm0, %v2144_v29 }
0x118f   :  { %5120 = vmatpush3.msra.mxu0 %v4747_v59 }
0x1190   :  { %5121 = vmatprep.subr.mxu0 %v4746_v60 }
0x1191   :  { %5122 = vmatpush3.msra.mxu0 %v4746_v60 }
0x1192   :  { %5123 = vmatprep.subr.mxu0 %v4745_v61 }
0x1193   :  { %5124 = vmatpush3.msra.mxu0 %v4745_v61 }
0x1194   :  { %5125 = vmatprep.subr.mxu0 %v4744_v62 }
0x1195   :  { %5126 = vmatpush3.msra.mxu0 %v4744_v62 }
0x1196   :  { %5130 = vmatprep.subr.mxu0 %v5424_v6 }
0x124e   :  { %v5099_v36 = vpop.f32.mrf.mxu0 }
0x124f   :  { %v2229_v31 = vadd.f32 %v5099_v36, %v4736_v35 }
0x1250   :  { %v2223_v37 = vpop.f32.mrf.mxu0 }
0x1251   :  { %v2224_v38 = vadd.f32 %v4736_v35, %v2223_v37  ;;  %v2233_v40 = vmax.f32 %v2229_v31, 0.0 }
0x1253   :  { %v2232_v39 = vmax.f32 %v2224_v38, 0.0 }
0x1255   :  { %5116 = vmatprep.mubr.msk.f32.mxu1 %vm2240_vm3, %v2232_v39 }
0x1256   :  { %5117 = vmatmul.mubr.msk.f32.vlgmr.msra.gmra.mxu1 %vm2240_vm3, %v2233_v40 }
0x1257   :  { %5137 = vmatprep.mubr.msk.f32.mxu1 %vm5425_vm1, %v5424_v6 }
0x1316   :  { %v5118_v42 = vpop.f32.mrf.mxu1 }
0x1317   :  { %v2319_v45 = vadd.f32 %v5118_v42, %v4739_v43 }
0x1318   :  { %v2313_v44 = vpop.f32.mrf.mxu1 }
0x1319   :  { %v2314_v46 = vadd.f32 %v4739_v43, %v2313_v44  ;;  %v2323_v2 = vadd.f32 %v2319_v45, %v2144_v29 }
0x131b   :  { %v2322_v47 = vadd.f32 %v2314_v46, %v5756_v16  ;;  %v2327_v49 = vsel %vm95_vm0, %v2323_v2, 0.0 }
0x131d   :  { %v2324_v48 = vsel %vm95_vm0, %v2322_v47, 0.0 }
0x131e   :  { %2325 = vadd.xlane.f32.xlu1 %v2324_v48 }
0x1322   :  { %2328 = vadd.xlane.f32.xlu1 %v2327_v49 }
0x13a7   :  { %v2326_v50 = vpop.xlane.xlu1 %2325 }
0x13a8   :  { %v2330_v51 = vmul.f32 0.03125, %v2326_v50 }
0x13aa   :  { %v2332_v52 = vsub.f32 %v2322_v47, %v2330_v51  ;;  %v5889_v51 = vld [vmem:[%s6122_s3 + $0x20] sm:$0xff] }
0x13ab   :  { %v2329_v53 = vpop.xlane.xlu1 %2328 }
0x13ac   :  { %v2331_v54 = vmul.f32 0.03125, %v2329_v53  ;;  %v2334_v55 = vmul.f32 %v2332_v52, %v2332_v52 }
0x13ae   :  { %v2333_v56 = vsub.f32 %v2323_v2, %v2331_v54  ;;  %v2336_v9 = vsel %vm95_vm0, %v2334_v55, 0.0 }
0x13af   :  { %2337 = vadd.xlane.f32.xlu0 %v2336_v9 }
0x13b0   :  { %v2335_v57 = vmul.f32 %v2333_v56, %v2333_v56 }
0x13b2   :  { %v2339_v58 = vsel %vm95_vm0, %v2335_v57, 0.0 }
0x13b3   :  { %2340 = vadd.xlane.f32.xlu1 %v2339_v58 }
0x1438   :  { %v2338_v63 = vpop.xlane.xlu0 %2337 }
0x1439   :  { %v2342_v0 = vmul.f32 0.03125, %v2338_v63 }
0x143b   :  { %v2344_v1 = vadd.f32 1e-05, %v2342_v0 }
0x143c   :  { %v2341_v3 = vpop.xlane.xlu1 %2340 }
0x143d   :  { %5333 = vrsqrt.f32 %v2344_v1  ;;  %v2343_v4 = vmul.f32 0.03125, %v2341_v3 }
0x143f   :  { %v2345_v7 = vadd.f32 1e-05, %v2343_v4 }
0x1441   :  { %5335 = vrsqrt.f32 %v2345_v7 }
0x144a   :  { %v5334_v41 = vpop.eup %5333 }
0x144b   :  { %v2348_v12 = vmul.f32 %v5334_v41, %v2332_v52  ;;  %v5895_v52 = vld [vmem:[%s6122_s3 + $0x28] sm:$0xff] }
0x144d   :  { %v2356_v13 = vmul.f32 %v4742_v10, %v2348_v12 }
0x144e   :  { %v5336_v14 = vpop.eup %5335 }
0x144f   :  { %v2349_v15 = vmul.f32 %v5336_v14, %v2333_v56  ;;  %v5832_v16 = vadd.f32 %v4743_v5, %v2356_v13 }
0x1451   :  { %v2357_v17 = vmul.f32 %v4742_v10, %v2349_v15  ;;  %5127 = vmatprep.mubr.msk.f32.mxu0 %vm95_vm0, %v5832_v16 }
0x1453   :  { %v5836_v18 = vadd.f32 %v4743_v5, %v2357_v17 }
0x1455   :  { %5128 = vmatmul.mubr.msk.f32.vlgmr.msra.gmra.mxu0 %vm95_vm0, %v5836_v18 }
0x1456   :  { %5132 = vmatprep.mubr.msk.f32.mxu0 %vm5425_vm1, %v5424_v6 }
0x1515   :  { %v5129_v8 = vpop.f32.mrf.mxu0 }
0x1516   :  { %v5845_v20 = vadd.f32 %v5129_v8, %v4772_v19  ;;  %v5931_v8 = vld [vmem:[%s6122_s3 + $0x30] sm:$0xff] }
0x1517   :  { %v2484_v21 = vpop.f32.mrf.mxu0 }
0x1518   :  { %v5847_v22 = vadd.f32 %v4772_v19, %v2484_v21 }
0x151a   :  { %2494 = vrot.lane.b32.xlu1 %v5847_v22, %s5427_s25 }
0x151e   :  { %2660 = vrot.lane.b32.xlu1 %v5847_v22, %s5428_s26 }
0x1522   :  { %2658 = vrot.lane.b32.xlu1 %v5847_v22, %s5426_s24 }
0x158c   :  { %v2495_v23 = vpop.permute.xlu1 %2494 }
0x158d   :  { %5131 = vmatpush3.xpose.msk.msra.mxu0 %vm180_vm2, %v2495_v23 }
0x158e   :  { %5140 = vmatprep.subr.mxu0 %v5424_v6 }
0x1590   :  { %5133 = vmatmul.mubr.msk.f32.vlgmr.msra.gmra.mxu0 %vm180_vm2, %v5847_v22  ;;  %v2661_v11 = vpop.permute.xlu1 %2660 }
0x1591   :  { %5141 = vmatpush3.xpose.msk.msra.mxu0 %vm180_vm2, %v2661_v11  ;;  %5142 = vmatprep.mubr.msk.f32.mxu0 %vm5425_vm1, %v5424_v6 }
0x1592   :  { %5150 = vmatprep.subr.mxu0 %v5424_v6 }
0x1594   :  { %v2659_v24 = vpop.permute.xlu1 %2658 }
0x1595   :  { %5143 = vmatmul.mubr.msk.f32.vlgmr.msra.gmra.mxu0 %vm180_vm2, %v2659_v24 }
0x1596   :  { %5152 = vmatprep.mubr.msk.f32.mxu0 %vm5425_vm1, %v5424_v6  ;;  %5151 = vmatpush3.msra.mxu0 %v5895_v52 }
0x1597   :  { %5160 = vmatprep.subr.mxu0 %v5424_v6 }
0x1650   :  { %v2566_v25 = vpop.f32.mrf.mxu0 }
0x1651   :  { %v2570_v26 = vmul.f32 0.35355338, %v2566_v25 }
0x1652   :  { %v5134_v27 = vpop.f32.mrf.mxu0 }
0x1653   :  { %v2571_v28 = vsel %vm180_vm2, %v2570_v26, -inf }
0x1654   :  { %2572 = vmax.xlane.f32.xlu0 %v2571_v28 }
0x1655   :  { %v2732_v29 = vpop.f32.mrf.mxu0 }
0x1656   :  { %v2736_v30 = vmul.f32 0.35355338, %v2732_v29 }
0x1657   :  { %v5144_v32 = vpop.f32.mrf.mxu0 }
0x1658   :  { %v2737_v33 = vsel %vm180_vm2, %v2736_v30, -inf }
0x1659   :  { %2738 = vmax.xlane.f32.xlu1 %v2737_v33 }
0x166a   :  { %2582 = vrot.lane.b32.xlu0 %v5847_v22, %s5430_s30  ;;  %2972 = vrot.lane.b32.xlu1 %v5847_v22, %s5431_s14 }
0x16dd   :  { %v2573_v34 = vpop.xlane.xlu0 %2572 }
0x16de   :  { %v2574_v35 = vsub.f32 %v2570_v26, %v2573_v34 }
0x16e0   :  { %v2575_v36 = vmul.f32 1.442695, %v2574_v35 }
0x16e1   :  { %v2583_v31 = vpop.permute.xlu0 %2582 }
0x16e2   :  { %5337 = vpow2.f32 %v2575_v36  ;;  %5136 = vmatpush3.msra.mxu1 %v2583_v31  ;;  %v2739_v37 = vpop.xlane.xlu1 %2738 }
0x16e3   :  { %v2740_v38 = vsub.f32 %v2736_v30, %v2739_v37  ;;  %5145 = vmatprep.subr.mxu1 %v5424_v6 }
0x16e5   :  { %v2741_v39 = vmul.f32 1.442695, %v2740_v38 }
0x16e6   :  { %v2973_v56 = vpop.permute.xlu1 %2972 }
0x16e7   :  { %5339 = vpow2.f32 %v2741_v39 }
0x16ef   :  { %v5338_v40 = vpop.eup %5337 }
0x16f0   :  { %v2577_v42 = vsel %vm180_vm2, %v5338_v40, 0.0 }
0x16f1   :  { %2578 = vadd.xlane.f32.xlu0 %v2577_v42  ;;  %v5968_v42 = vld [vmem:[%s6122_s3 + $0x38] sm:$0xff] }
0x16f4   :  { %v5340_v43 = vpop.eup %5339 }
0x16f5   :  { %v2743_v44 = vsel %vm180_vm2, %v5340_v43, 0.0 }
0x16f6   :  { %2744 = vadd.xlane.f32.xlu0 %v2743_v44 }
0x170c   :  { %2748 = vrot.lane.b32.xlu0 %v5847_v22, %s5429_s27 }
0x1710   :  { %2970 = vrot.lane.b32.xlu0 %v5847_v22, %s5432_s15 }
0x177a   :  { %v2579_v45 = vpop.xlane.xlu0 %2578 }
0x177b   :  { %5341 = vrcp.f32 %v2579_v45 }
0x177f   :  { %v2745_v46 = vpop.xlane.xlu0 %2744 }
0x1780   :  { %5343 = vrcp.f32 %v2745_v46 }
0x1783   :  { %v2749_v2 = vpop.permute.xlu0 %2748 }
0x1787   :  { %v2971_v57 = vpop.permute.xlu0 %2970 }
0x1788   :  { %v5342_v47 = vpop.eup %5341 }
0x1789   :  { %v2581_v48 = vmul.f32 %v5342_v47, %v5338_v40 }
0x178b   :  { %5138 = vmatmul.mubr.msk.f32.vlgmr.msra.gmra.mxu1 %vm180_vm2, %v2581_v48 }
0x178c   :  { %5146 = vmatpush3.msra.mxu1 %v2749_v2  ;;  %5147 = vmatprep.mubr.msk.f32.mxu1 %vm5425_vm1, %v5424_v6 }
0x178d   :  { %v5344_v49 = vpop.eup %5343  ;;  %5155 = vmatprep.subr.mxu1 %v5424_v6 }
0x178e   :  { %v2747_v50 = vmul.f32 %v5344_v49, %v5340_v43 }
0x1790   :  { %5148 = vmatmul.mubr.msk.f32.vlgmr.msra.gmra.mxu1 %vm180_vm2, %v2747_v50 }
0x1791   :  { %5157 = vmatprep.mubr.msk.f32.mxu1 %vm5425_vm1, %v5424_v6  ;;  %5156 = vmatpush3.msra.mxu1 %v5889_v51 }
0x1792   :  { %5165 = vmatprep.subr.mxu1 %v5424_v6 }
0x184b   :  { %v2654_v53 = vpop.f32.mrf.mxu1 }
0x184c   :  { %5158 = vmatmul.mubr.msk.f32.vlgmr.msra.gmra.mxu1 %vm180_vm2, %v2654_v53 }
0x184d   :  { %v5139_v54 = vpop.f32.mrf.mxu1  ;;  %5167 = vmatprep.mubr.msk.f32.mxu1 %vm5425_vm1, %v5424_v6 }
0x1850   :  { %v2820_v55 = vpop.f32.mrf.mxu1 }
0x1851   :  { %5153 = vmatmul.mubr.msk.f32.vlgmr.msra.gmra.mxu0 %vm180_vm2, %v2820_v55 }
0x1852   :  { %5161 = vmatpush3.xpose.msk.msra.mxu0 %vm180_vm2, %v2973_v56  ;;  %v5149_v9 = vpop.f32.mrf.mxu1  ;;  %5162 = vmatprep.mubr.msk.f32.mxu0 %vm5425_vm1, %v5424_v6 }
0x1853   :  { %5170 = vmatprep.subr.mxu0 %v5424_v6 }
0x1855   :  { %5163 = vmatmul.mubr.msk.f32.vlgmr.msra.gmra.mxu0 %vm180_vm2, %v2971_v57 }
0x1856   :  { %5172 = vmatprep.mubr.msk.f32.mxu0 %vm5425_vm1, %v5424_v6  ;;  %5171 = vmatpush3.msra.mxu0 %v5931_v8 }
0x1857   :  { %5180 = vmatprep.subr.mxu0 %v5424_v6 }
0x190c   :  { %v2966_v58 = vpop.f32.mrf.mxu1 }
0x190e   :  { %v5159_v59 = vpop.f32.mrf.mxu1 }
0x1911   :  { %v2893_v60 = vpop.f32.mrf.mxu0 }
0x1912   :  { %v2967_v61 = vadd.f32 %v2966_v58, %v2893_v60 }
0x1913   :  { %v5154_v62 = vpop.f32.mrf.mxu0 }
0x1915   :  { %v3044_v63 = vpop.f32.mrf.mxu0 }
0x1916   :  { %v3048_v0 = vmul.f32 0.35355338, %v3044_v63 }
0x1917   :  { %v5164_v1 = vpop.f32.mrf.mxu0 }
0x1918   :  { %v3049_v3 = vsel %vm180_vm2, %v3048_v0, -inf }
0x1919   :  { %3050 = vmax.xlane.f32.xlu0 %v3049_v3 }
0x192f   :  { %3060 = vrot.lane.b32.xlu0 %v5847_v22, %s5435_s21 }
0x1933   :  { %3210 = vrot.lane.b32.xlu0 %v5847_v22, %s5434_s0 }
0x19a2   :  { %v3051_v4 = vpop.xlane.xlu0 %3050 }
0x19a3   :  { %v3052_v7 = vsub.f32 %v3048_v0, %v3051_v4 }
0x19a5   :  { %v3053_v41 = vmul.f32 1.442695, %v3052_v7 }
0x19a6   :  { %v3061_v10 = vpop.permute.xlu0 %3060 }
0x19a7   :  { %5345 = vpow2.f32 %v3053_v41  ;;  %5166 = vmatpush3.msra.mxu1 %v3061_v10 }
0x19a8   :  { %5175 = vmatprep.subr.mxu1 %v5424_v6 }
0x19aa   :  { %v3211_v19 = vpop.permute.xlu0 %3210 }
0x19b4   :  { %v5346_v12 = vpop.eup %5345 }
0x19b5   :  { %v3055_v5 = vsel %vm180_vm2, %v5346_v12, 0.0 }
0x19b6   :  { %3056 = vadd.xlane.f32.xlu1 %v3055_v5 }
0x19c7   :  { %3212 = vrot.lane.b32.xlu1 %v5847_v22, %s5433_s20 }
0x1a3f   :  { %v3057_v13 = vpop.xlane.xlu1 %3056 }
0x1a40   :  { %5347 = vrcp.f32 %v3057_v13 }
0x1a43   :  { %v3213_v17 = vpop.permute.xlu1 %3212 }
0x1a4d   :  { %v5348_v14 = vpop.eup %5347 }
0x1a4e   :  { %v3059_v15 = vmul.f32 %v5348_v14, %v5346_v12 }
0x1a50   :  { %5168 = vmatmul.mubr.msk.f32.vlgmr.msra.gmra.mxu1 %vm180_vm2, %v3059_v15 }
0x1a51   :  { %5176 = vmatpush3.xpose.msk.msra.mxu1 %vm180_vm2, %v3213_v17  ;;  %5177 = vmatprep.mubr.msk.f32.mxu1 %vm5425_vm1, %v5424_v6 }
0x1a52   :  { %5185 = vmatprep.subr.mxu1 %v5424_v6 }
0x1a54   :  { %5178 = vmatmul.mubr.msk.f32.vlgmr.msra.gmra.mxu1 %vm180_vm2, %v3211_v19 }
0x1a55   :  { %5187 = vmatprep.mubr.msk.f32.mxu1 %vm5425_vm1, %v5424_v6  ;;  %5186 = vmatpush3.msra.mxu1 %v5968_v42 }
0x1a56   :  { %5195 = vmatprep.subr.mxu1 %v5424_v6 }
0x1b10   :  { %v3132_v21 = vpop.f32.mrf.mxu1 }
0x1b11   :  { %5173 = vmatmul.mubr.msk.f32.vlgmr.msra.gmra.mxu0 %vm180_vm2, %v3132_v21 }
0x1b12   :  { %v5169_v23 = vpop.f32.mrf.mxu1  ;;  %5182 = vmatprep.mubr.msk.f32.mxu0 %vm5425_vm1, %v5424_v6 }
0x1b14   :  { %v3284_v11 = vpop.f32.mrf.mxu1 }
0x1b15   :  { %v3288_v24 = vmul.f32 0.35355338, %v3284_v11 }
0x1b16   :  { %v5179_v25 = vpop.f32.mrf.mxu1 }
0x1b17   :  { %v3289_v26 = vsel %vm180_vm2, %v3288_v24, -inf }
0x1b18   :  { %3290 = vmax.xlane.f32.xlu0 %v3289_v26 }
0x1b2e   :  { %3300 = vrot.lane.b32.xlu0 %v5847_v22, %s6137_s18 }
0x1b32   :  { %3617 = vrot.lane.b32.xlu0 %v5845_v20, %s5428_s26 }
0x1b36   :  { %3615 = vrot.lane.b32.xlu0 %v5845_v20, %s5426_s24 }
0x1ba1   :  { %v3291_v27 = vpop.xlane.xlu0 %3290 }
0x1ba2   :  { %v3292_v28 = vsub.f32 %v3288_v24, %v3291_v27 }
0x1ba4   :  { %v3293_v29 = vmul.f32 1.442695, %v3292_v28 }
0x1ba5   :  { %v3301_v30 = vpop.permute.xlu0 %3300 }
0x1ba6   :  { %5349 = vpow2.f32 %v3293_v29  ;;  %5181 = vmatpush3.msra.mxu0 %v3301_v30 }
0x1ba7   :  { %5190 = vmatprep.subr.mxu0 %v5424_v6 }
0x1ba9   :  { %v3618_v39 = vpop.permute.xlu0 %3617 }
0x1bad   :  { %v3616_v40 = vpop.permute.xlu0 %3615 }
0x1bb3   :  { %v5350_v32 = vpop.eup %5349 }
0x1bb4   :  { %v3295_v33 = vsel %vm180_vm2, %v5350_v32, 0.0 }
0x1bb5   :  { %3296 = vadd.xlane.f32.xlu1 %v3295_v33 }
0x1bc6   :  { %3451 = vrot.lane.b32.xlu1 %v5845_v20, %s5427_s25 }
0x1bd1   :  { %v3205_v22 = vpop.f32.mrf.mxu0 }
0x1bd2   :  { %v3209_v34 = vadd.f32 %v3205_v22, %v2967_v61 }
0x1bd3   :  { %v5174_v35 = vpop.f32.mrf.mxu0 }
0x1c3e   :  { %v3297_v36 = vpop.xlane.xlu1 %3296 }
0x1c3f   :  { %5351 = vrcp.f32 %v3297_v36 }
0x1c42   :  { %v3452_v38 = vpop.permute.xlu1 %3451 }
0x1c4c   :  { %v5352_v31 = vpop.eup %5351 }
0x1c4d   :  { %v3299_v37 = vmul.f32 %v5352_v31, %v5350_v32 }
0x1c4f   :  { %5183 = vmatmul.mubr.msk.f32.vlgmr.msra.gmra.mxu0 %vm180_vm2, %v3299_v37 }
0x1c50   :  { %5191 = vmatpush3.xpose.msk.msra.mxu0 %vm180_vm2, %v3452_v38  ;;  %5192 = vmatprep.mubr.msk.f32.mxu0 %vm5425_vm1, %v5424_v6 }
0x1c51   :  { %5200 = vmatprep.subr.mxu0 %v5424_v6 }
0x1c53   :  { %5193 = vmatmul.mubr.msk.f32.vlgmr.msra.gmra.mxu0 %vm180_vm2, %v5845_v20 }
0x1c54   :  { %5201 = vmatpush3.xpose.msk.msra.mxu0 %vm180_vm2, %v3618_v39  ;;  %5202 = vmatprep.mubr.msk.f32.mxu0 %vm5425_vm1, %v5424_v6  ;;  %v4807_v39 = vld [vmem:[%s6123_s4 + $0x1] ss:$0 sm:$0xff] }
0x1c55   :  { %5210 = vmatprep.subr.mxu0 %v5424_v6 }
0x1c57   :  { %5203 = vmatmul.mubr.msk.f32.vlgmr.msra.gmra.mxu0 %vm180_vm2, %v3616_v40 }
0x1c58   :  { %5211 = vmatpush3.msra.mxu0 %v5895_v52  ;;  %5212 = vmatprep.mubr.msk.f32.mxu0 %vm5425_vm1, %v5424_v6 }
0x1c59   :  { %5220 = vmatprep.subr.mxu0 %v5424_v6 }
0x1d0f   :  { %v3372_v43 = vpop.f32.mrf.mxu0 }
0x1d10   :  { %5188 = vmatmul.mubr.msk.f32.vlgmr.msra.gmra.mxu1 %vm180_vm2, %v3372_v43 }
0x1d11   :  { %v5184_v44 = vpop.f32.mrf.mxu0  ;;  %5197 = vmatprep.mubr.msk.f32.mxu1 %vm5425_vm1, %v5424_v6 }
0x1d13   :  { %v3523_v45 = vpop.f32.mrf.mxu0 }
0x1d14   :  { %v3527_v46 = vmul.f32 0.35355338, %v3523_v45 }
0x1d15   :  { %v5194_v47 = vpop.f32.mrf.mxu0 }
0x1d16   :  { %v3528_v48 = vsel %vm180_vm2, %v3527_v46, -inf }
0x1d17   :  { %3529 = vmax.xlane.f32.xlu0 %v3528_v48  ;;  %v3689_v2 = vpop.f32.mrf.mxu0 }
0x1d18   :  { %v3693_v49 = vmul.f32 0.35355338, %v3689_v2 }
0x1d19   :  { %v5204_v50 = vpop.f32.mrf.mxu0 }
0x1d1a   :  { %v3694_v52 = vsel %vm180_vm2, %v3693_v49, -inf }
0x1d1b   :  { %3695 = vmax.xlane.f32.xlu1 %v3694_v52 }
0x1d2c   :  { %3539 = vrot.lane.b32.xlu1 %v5845_v20, %s5430_s30 }
0x1d30   :  { %3929 = vrot.lane.b32.xlu1 %v5845_v20, %s5431_s14 }
0x1d34   :  { %3927 = vrot.lane.b32.xlu1 %v5845_v20, %s5432_s15 }
0x1da0   :  { %v3530_v53 = vpop.xlane.xlu0 %3529 }
0x1da1   :  { %v3531_v54 = vsub.f32 %v3527_v46, %v3530_v53 }
0x1da3   :  { %v3532_v55 = vmul.f32 1.442695, %v3531_v54 }
0x1da4   :  { %v3696_v56 = vpop.xlane.xlu1 %3695 }
0x1da5   :  { %5353 = vpow2.f32 %v3532_v55  ;;  %v3697_v9 = vsub.f32 %v3693_v49, %v3696_v56 }
0x1da7   :  { %v3698_v57 = vmul.f32 1.442695, %v3697_v9 }
0x1da8   :  { %v3540_v58 = vpop.permute.xlu1 %3539 }
0x1da9   :  { %5355 = vpow2.f32 %v3698_v57  ;;  %5196 = vmatpush3.msra.mxu1 %v3540_v58 }
0x1daa   :  { %5205 = vmatprep.subr.mxu1 %v5424_v6 }
0x1dac   :  { %v3930_v14 = vpop.permute.xlu1 %3929 }
0x1db2   :  { %v5354_v59 = vpop.eup %5353 }
0x1db3   :  { %v3534_v60 = vsel %vm180_vm2, %v5354_v59, 0.0 }
0x1db4   :  { %3535 = vadd.xlane.f32.xlu0 %v3534_v60 }
0x1db6   :  { %v5356_v61 = vpop.eup %5355 }
0x1db7   :  { %v3700_v62 = vsel %vm180_vm2, %v5356_v61, 0.0 }
0x1db8   :  { %3701 = vadd.xlane.f32.xlu0 %v3700_v62 }
0x1dce   :  { %3705 = vrot.lane.b32.xlu0 %v5845_v20, %s5429_s27 }
0x1dd0   :  { %v3445_v63 = vpop.f32.mrf.mxu1 }
0x1dd1   :  { %v5988_v0 = vadd.f32 %v3445_v63, %v3209_v34 }
0x1dd2   :  { %v5189_v1 = vpop.f32.mrf.mxu1 }
0x1dd3   :  { %v4413_v44 = vadd.f32 %v4807_v39, %v5988_v0 }
0x1dd5   :  { %v4415_v48 = vadd.f32 %v4413_v44, %v5832_v16  ;;  %v4761_v44 = vld [vmem:[%s6128_s9 + $0x40] sm:$0xff] }
0x1dd7   :  { %v4417_v2 = vsel %vm95_vm0, %v4415_v48, 0.0 }
0x1e3d   :  { %v3536_v3 = vpop.xlane.xlu0 %3535 }
0x1e3e   :  { %5357 = vrcp.f32 %v3536_v3 }
0x1e41   :  { %v3702_v4 = vpop.xlane.xlu0 %3701 }
0x1e42   :  { %5359 = vrcp.f32 %v3702_v4 }
0x1e45   :  { %v3706_v10 = vpop.permute.xlu0 %3705 }
0x1e4b   :  { %v5358_v7 = vpop.eup %5357 }
0x1e4c   :  { %v3538_v41 = vmul.f32 %v5358_v7, %v5354_v59 }
0x1e4e   :  { %5198 = vmatmul.mubr.msk.f32.vlgmr.msra.gmra.mxu1 %vm180_vm2, %v3538_v41 }
0x1e4f   :  { %v5360_v12 = vpop.eup %5359  ;;  %5206 = vmatpush3.msra.mxu1 %v3706_v10  ;;  %5207 = vmatprep.mubr.msk.f32.mxu1 %vm5425_vm1, %v5424_v6 }
0x1e50   :  { %v3704_v5 = vmul.f32 %v5360_v12, %v5356_v61  ;;  %5215 = vmatprep.subr.mxu1 %v5424_v6 }
0x1e52   :  { %5208 = vmatmul.mubr.msk.f32.vlgmr.msra.gmra.mxu1 %vm180_vm2, %v3704_v5 }
0x1e53   :  { %5216 = vmatpush3.msra.mxu1 %v5889_v51  ;;  %5217 = vmatprep.mubr.msk.f32.mxu1 %vm5425_vm1, %v5424_v6  ;;  %v3928_v51 = vpop.permute.xlu1 %3927 }
0x1e54   :  { %5225 = vmatprep.subr.mxu1 %v5424_v6 }
0x1f0e   :  { %v3611_v13 = vpop.f32.mrf.mxu1 }
0x1f0f   :  { %5218 = vmatmul.mubr.msk.f32.vlgmr.msra.gmra.mxu1 %vm180_vm2, %v3611_v13 }
0x1f10   :  { %v5199_v15 = vpop.f32.mrf.mxu1  ;;  %5227 = vmatprep.mubr.msk.f32.mxu1 %vm5425_vm1, %v5424_v6 }
0x1f12   :  { %v3777_v17 = vpop.f32.mrf.mxu1 }
0x1f13   :  { %5213 = vmatmul.mubr.msk.f32.vlgmr.msra.gmra.mxu0 %vm180_vm2, %v3777_v17 }
0x1f14   :  { %5221 = vmatpush3.xpose.msk.msra.mxu0 %vm180_vm2, %v3930_v14  ;;  %v5209_v19 = vpop.f32.mrf.mxu1  ;;  %5222 = vmatprep.mubr.msk.f32.mxu0 %vm5425_vm1, %v5424_v6 }
0x1f15   :  { %5230 = vmatprep.subr.mxu0 %v5424_v6 }
0x1f17   :  { %5223 = vmatmul.mubr.msk.f32.vlgmr.msra.gmra.mxu0 %vm180_vm2, %v3928_v51 }
0x1f18   :  { %5231 = vmatpush3.msra.mxu0 %v5931_v8  ;;  %5232 = vmatprep.mubr.msk.f32.mxu0 %vm5425_vm1, %v5424_v6 }
0x1f19   :  { %5240 = vmatprep.subr.mxu0 %v5424_v6 }
0x1fcf   :  { %v3923_v21 = vpop.f32.mrf.mxu1 }
0x1fd1   :  { %v5219_v23 = vpop.f32.mrf.mxu1 }
0x1fd3   :  { %v3850_v11 = vpop.f32.mrf.mxu0 }
0x1fd4   :  { %v3924_v24 = vadd.f32 %v3923_v21, %v3850_v11  ;;  %v4809_v11 = vld [vmem:[%s6125_s6 + $0x1] ss:$0 sm:$0xff] }
0x1fd5   :  { %v5214_v25 = vpop.f32.mrf.mxu0 }
0x1fd7   :  { %v4001_v26 = vpop.f32.mrf.mxu0 }
0x1fd8   :  { %v4005_v27 = vmul.f32 0.35355338, %v4001_v26  ;;  %v4759_v26 = vld [vmem:[%s6126_s7 + $0x38] sm:$0xff] }
0x1fd9   :  { %v5224_v28 = vpop.f32.mrf.mxu0 }
0x1fda   :  { %v4006_v29 = vsel %vm180_vm2, %v4005_v27, -inf  ;;  %v4757_v28 = vld [vmem:[%s6126_s7 + $0x28] sm:$0xff] }
0x1fdb   :  { %4007 = vmax.xlane.f32.xlu0 %v4006_v29  ;;  %v4756_v29 = vld [vmem:[%s6126_s7 + $0x20] sm:$0xff] }
0x1ff1   :  { %4017 = vrot.lane.b32.xlu0 %v5845_v20, %s5435_s21 }
0x1ff5   :  { %4167 = vrot.lane.b32.xlu0 %v5845_v20, %s5434_s0 }
0x2064   :  { %v4008_v8 = vpop.xlane.xlu0 %4007 }
0x2065   :  { %v4009_v30 = vsub.f32 %v4005_v27, %v4008_v8  ;;  %v4758_v27 = vld [vmem:[%s6126_s7 + $0x30] sm:$0xff]  ;;  %v4768_v8 = vld [vmem:[%s6128_s9 + $0x78] sm:$0xff] }
0x2067   :  { %v4010_v32 = vmul.f32 1.442695, %v4009_v30  ;;  %v4767_v30 = vld [vmem:[%s6128_s9 + $0x70] sm:$0xff] }
0x2068   :  { %v4018_v33 = vpop.permute.xlu0 %4017 }
0x2069   :  { %5361 = vpow2.f32 %v4010_v32  ;;  %5226 = vmatpush3.msra.mxu1 %v4018_v33  ;;  %v4766_v32 = vld [vmem:[%s6128_s9 + $0x68] sm:$0xff]  ;;  %v4765_v33 = vld [vmem:[%s6128_s9 + $0x60] sm:$0xff] }
0x206a   :  { %5235 = vmatprep.subr.mxu1 %v5424_v6 }
0x206c   :  { %v4168_v38 = vpop.permute.xlu0 %4167 }
0x2076   :  { %v5362_v22 = vpop.eup %5361 }
0x2077   :  { %v4012_v34 = vsel %vm180_vm2, %v5362_v22, 0.0 }
0x2078   :  { %4013 = vadd.xlane.f32.xlu1 %v4012_v34 }
0x2089   :  { %4169 = vrot.lane.b32.xlu1 %v5845_v20, %s5433_s20 }
0x2101   :  { %v4014_v35 = vpop.xlane.xlu1 %4013 }
0x2102   :  { %5363 = vrcp.f32 %v4014_v35 }
0x2105   :  { %v4170_v37 = vpop.permute.xlu1 %4169 }
0x210f   :  { %v5364_v36 = vpop.eup %5363 }
0x2110   :  { %v4016_v31 = vmul.f32 %v5364_v36, %v5362_v22 }
0x2112   :  { %5228 = vmatmul.mubr.msk.f32.vlgmr.msra.gmra.mxu1 %vm180_vm2, %v4016_v31 }
0x2113   :  { %5236 = vmatpush3.xpose.msk.msra.mxu1 %vm180_vm2, %v4170_v37  ;;  %5237 = vmatprep.mubr.msk.f32.mxu1 %vm5425_vm1, %v5424_v6 }
0x2114   :  { %5245 = vmatprep.subr.mxu1 %v5424_v6 }
0x2116   :  { %5238 = vmatmul.mubr.msk.f32.vlgmr.msra.gmra.mxu1 %vm180_vm2, %v4168_v38 }
0x2117   :  { %5246 = vmatpush3.msra.mxu1 %v5968_v42  ;;  %5247 = vmatprep.mubr.msk.f32.mxu1 %vm5425_vm1, %v5424_v6 }
0x2118   :  { %5261 = vmatprep.subr.mxu1 %v4768_v8 }
0x21d2   :  { %v4089_v40 = vpop.f32.mrf.mxu1 }
0x21d3   :  { %5233 = vmatmul.mubr.msk.f32.vlgmr.msra.gmra.mxu0 %vm180_vm2, %v4089_v40  ;;  %v4763_v40 = vld [vmem:[%s6128_s9 + $0x50] sm:$0xff] }
0x21d4   :  { %v5229_v43 = vpop.f32.mrf.mxu1  ;;  %5242 = vmatprep.mubr.msk.f32.mxu0 %vm5425_vm1, %v5424_v6 }
0x21d5   :  { %v4762_v43 = vld [vmem:[%s6128_s9 + $0x48] sm:$0xff] }
0x21d6   :  { %v4241_v45 = vpop.f32.mrf.mxu1 }
0x21d7   :  { %v4245_v46 = vmul.f32 0.35355338, %v4241_v45  ;;  %v4810_v45 = vld [vmem:[%s6127_s8 + $0x1] ss:$0 sm:$0xff] }
0x21d8   :  { %v5239_v47 = vpop.f32.mrf.mxu1 }
0x21d9   :  { %v4246_v42 = vsel %vm180_vm2, %v4245_v46, -inf }
0x21da   :  { %4247 = vmax.xlane.f32.xlu1 %v4246_v42 }
0x21de   :  { %4418 = vadd.xlane.f32.xlu1 %v4417_v2 }
0x2263   :  { %v4248_v49 = vpop.xlane.xlu1 %4247 }
0x2264   :  { %v4249_v50 = vsub.f32 %v4245_v46, %v4248_v49 }
0x2266   :  { %v4250_v52 = vmul.f32 1.442695, %v4249_v50 }
0x2267   :  { %v4419_v61 = vpop.xlane.xlu1 %4418 }
0x2268   :  { %5365 = vpow2.f32 %v4250_v52  ;;  %v4423_v62 = vmul.f32 0.03125, %v4419_v61  ;;  %v4813_v52 = vld [vmem:[%s6129_s10 + $0x1] ss:$0 sm:$0xff] }
0x226a   :  { %v4425_v1 = vsub.f32 %v4415_v48, %v4423_v62 }
0x226c   :  { %v4427_v41 = vmul.f32 %v4425_v1, %v4425_v1 }
0x226e   :  { %v4429_v10 = vsel %vm95_vm0, %v4427_v41, 0.0 }
0x2275   :  { %v5366_v53 = vpop.eup %5365 }
0x2276   :  { %v4252_v6 = vsel %vm180_vm2, %v5366_v53, 0.0 }
0x2277   :  { %4253 = vadd.xlane.f32.xlu0 %v4252_v6 }
0x228d   :  { %4257 = vrot.lane.b32.xlu0 %v5845_v20, %s6137_s18 }
0x2293   :  { %v4162_v54 = vpop.f32.mrf.mxu0 }
0x2294   :  { %v4166_v55 = vadd.f32 %v4162_v54, %v3924_v24 }
0x2295   :  { %v5234_v56 = vpop.f32.mrf.mxu0 }
0x2300   :  { %v4254_v9 = vpop.xlane.xlu0 %4253 }
0x2301   :  { %5367 = vrcp.f32 %v4254_v9 }
0x2304   :  { %v4258_v16 = vpop.permute.xlu0 %4257 }
0x2305   :  { %5241 = vmatpush3.msra.mxu0 %v4258_v16 }
0x2306   :  { %5250 = vmatprep.subr.mxu0 %v4759_v26 }
0x230e   :  { %v5368_v57 = vpop.eup %5367 }
0x230f   :  { %v4256_v58 = vmul.f32 %v5368_v57, %v5366_v53 }
0x2311   :  { %5243 = vmatmul.mubr.msk.f32.vlgmr.msra.gmra.mxu0 %vm180_vm2, %v4256_v58 }
0x2312   :  { %5251 = vmatpush3.msra.mxu0 %v4759_v26 }
0x2313   :  { %5252 = vmatprep.subr.mxu0 %v4758_v27 }
0x2314   :  { %5253 = vmatpush3.msra.mxu0 %v4758_v27 }
0x2315   :  { %5254 = vmatprep.subr.mxu0 %v4757_v28 }
0x2316   :  { %5255 = vmatpush3.msra.mxu0 %v4757_v28 }
0x2317   :  { %5256 = vmatprep.subr.mxu0 %v4756_v29 }
0x2318   :  { %5257 = vmatpush3.msra.mxu0 %v4756_v29 }
0x23d1   :  { %v4329_v59 = vpop.f32.mrf.mxu0 }
0x23d2   :  { %5248 = vmatmul.mubr.msk.f32.vlgmr.msra.gmra.mxu1 %vm180_vm2, %v4329_v59 }
0x23d3   :  { %v5244_v60 = vpop.f32.mrf.mxu0  ;;  %5262 = vmatpush3.msra.mxu1 %v4768_v8 }
0x23d4   :  { %5263 = vmatprep.subr.mxu1 %v4767_v30 }
0x23d5   :  { %5264 = vmatpush3.msra.mxu1 %v4767_v30 }
0x23d6   :  { %5265 = vmatprep.subr.mxu1 %v4766_v32 }
0x23d7   :  { %5266 = vmatpush3.msra.mxu1 %v4766_v32 }
0x23d8   :  { %5267 = vmatprep.subr.mxu1 %v4765_v33 }
0x23d9   :  { %5268 = vmatpush3.msra.mxu1 %v4765_v33 }
0x2492   :  { %v4402_v63 = vpop.f32.mrf.mxu1 }
0x2493   :  { %v4406_v0 = vadd.f32 %v4402_v63, %v4166_v55 }
0x2494   :  { %v5249_v20 = vpop.f32.mrf.mxu1 }
0x2495   :  { %v4414_v3 = vadd.f32 %v4807_v39, %v4406_v0  ;;  %v4764_v39 = vld [vmem:[%s6128_s9 + $0x58] sm:$0xff] }
0x2496   :  { %5269 = vmatprep.subr.mxu1 %v4764_v39 }
0x2497   :  { %v4416_v4 = vadd.f32 %v4414_v3, %v5836_v18  ;;  %v4808_v18 = vld [vmem:[%s6124_s5 + $0x1] ss:$0 sm:$0xff]  ;;  %5270 = vmatpush3.msra.mxu1 %v4764_v39  ;;  %s5437_s5 = smov [#allocation5]  }
0x2498   :  { %5271 = vmatprep.subr.mxu1 %v4763_v40  ;;  %s4686_s1 = sshll.u32 %s5437_s5, 4  ;;  %s4687_s1 = int_to_ptr.vmem [resolvable:$true] %s4686_s1 }
0x2499   :  { %v4420_v7 = vsel %vm95_vm0, %v4416_v4, 0.0  ;;  %5272 = vmatpush3.msra.mxu1 %v4763_v40  ;;  %s5397_s6 = scalar_lea.vmem %s4687_s1, 256  ;;  %p5402_p6 = scmp.lt.s32.totalorder %s4687_s1, %s4687_s1 }
0x249a   :  { %4421 = vadd.xlane.f32.xlu1 %v4420_v7  ;;  %5273 = vmatprep.subr.mxu1 %v4762_v43  ;;  %p5398_p5 = scmp.ne.s32.totalorder %s4687_s1, %s5397_s6  ;;  %p5403_p7 = scmp.lt.s32.totalorder %s5397_s6, %s5397_s6 }
0x249b   :  { %5274 = vmatpush3.msra.mxu1 %v4762_v43 }
0x249c   :  { %5275 = vmatprep.subr.mxu1 %v4761_v44  ;;  %p5404_p8 = por %p5403_p7, %p5402_p6 }
0x249d   :  { %5276 = vmatpush3.msra.mxu1 %v4761_v44 }
0x249e   :  { %4430 = vadd.xlane.f32.xlu1 %v4429_v10  ;;  %p5405_p9 = pnand %p5404_p8, %p5398_p5 }
0x2523   :  { %v4422_v12 = vpop.xlane.xlu1 %4421 }
0x2524   :  { %v4424_v5 = vmul.f32 0.03125, %v4422_v12 }
0x2526   :  { %v4426_v13 = vsub.f32 %v4416_v4, %v4424_v5 }
0x2527   :  { %v4431_v14 = vpop.xlane.xlu1 %4430 }
0x2528   :  { %v4435_v15 = vmul.f32 0.03125, %v4431_v14  ;;  %v4428_v17 = vmul.f32 %v4426_v13, %v4426_v13 }
0x252a   :  { %v4437_v19 = vadd.f32 1e-05, %v4435_v15  ;;  %v4432_v51 = vsel %vm95_vm0, %v4428_v17, 0.0  ;;  %v4817_v15 = vld [vmem:[%s6131_s12 + $0x1] ss:$0 sm:$0xff] }
0x252b   :  { %4433 = vadd.xlane.f32.xlu1 %v4432_v51 }
0x252c   :  { %5369 = vrsqrt.f32 %v4437_v19 }
0x2539   :  { %v5370_v21 = vpop.eup %5369 }
0x253a   :  { %v4441_v23 = vmul.f32 %v5370_v21, %v4425_v1 }
0x253c   :  { %v4449_v24 = vmul.f32 %v4808_v18, %v4441_v23 }
0x253e   :  { %v4457_v25 = vadd.f32 %v4809_v11, %v4449_v24 }
0x2540   :  { %5258 = vmatprep.mubr.msk.f32.mxu0 %vm95_vm0, %v4457_v25 }
0x25b4   :  { %v4434_v22 = vpop.xlane.xlu1 %4433 }
0x25b5   :  { %v4436_v34 = vmul.f32 0.03125, %v4434_v22 }
0x25b7   :  { %v4438_v35 = vadd.f32 1e-05, %v4436_v34 }
0x25b9   :  { %5371 = vrsqrt.f32 %v4438_v35 }
0x25c6   :  { %v5372_v36 = vpop.eup %5371 }
0x25c7   :  { %v4442_v31 = vmul.f32 %v5372_v36, %v4426_v13  ;;  %v4816_v13 = vld [vmem:[%s6130_s11 + $0x1] ss:$0 sm:$0xff] }
0x25c9   :  { %v4450_v37 = vmul.f32 %v4808_v18, %v4442_v31 }
0x25cb   :  { %v4458_v38 = vadd.f32 %v4809_v11, %v4450_v37 }
0x25cd   :  { %5259 = vmatmul.mubr.msk.f32.vlgmr.msra.gmra.mxu0 %vm95_vm0, %v4458_v38 }
0x268d   :  { %v5260_v46 = vpop.f32.mrf.mxu0 }
0x268e   :  { %v4543_v47 = vadd.f32 %v5260_v46, %v4810_v45 }
0x268f   :  { %v4537_v42 = vpop.f32.mrf.mxu0 }
0x2690   :  { %v4538_v48 = vadd.f32 %v4810_v45, %v4537_v42  ;;  %v4547_v49 = vmax.f32 %v4543_v47, 0.0 }
0x2692   :  { %v4546_v2 = vmax.f32 %v4538_v48, 0.0 }
0x2694   :  { %5277 = vmatprep.mubr.msk.f32.mxu1 %vm2240_vm3, %v4546_v2 }
0x2695   :  { %5278 = vmatmul.mubr.msk.f32.vlgmr.msra.gmra.mxu1 %vm2240_vm3, %v4547_v49 }
0x2755   :  { %v5279_v50 = vpop.f32.mrf.mxu1 }
0x2756   :  { %v4632_v6 = vadd.f32 %v5279_v50, %v4813_v52 }
0x2757   :  { %v4626_v53 = vpop.f32.mrf.mxu1 }
0x2758   :  { %v4627_v54 = vadd.f32 %v4813_v52, %v4626_v53  ;;  %v4636_v9 = vadd.f32 %v4632_v6, %v4458_v38 }
0x275a   :  { %v4635_v55 = vadd.f32 %v4627_v54, %v4457_v25  ;;  %v4640_v16 = vsel %vm95_vm0, %v4636_v9, 0.0 }
0x275c   :  { %v4637_v56 = vsel %vm95_vm0, %v4635_v55, 0.0 }
0x275d   :  { %4638 = vadd.xlane.f32.xlu1 %v4637_v56 }
0x2761   :  { %4641 = vadd.xlane.f32.xlu1 %v4640_v16 }
0x27e6   :  { %v4639_v57 = vpop.xlane.xlu1 %4638 }
0x27e7   :  { %v4643_v58 = vmul.f32 0.03125, %v4639_v57 }
0x27e9   :  { %v4645_v59 = vsub.f32 %v4635_v55, %v4643_v58 }
0x27ea   :  { %v4642_v60 = vpop.xlane.xlu1 %4641 }
0x27eb   :  { %v4644_v61 = vmul.f32 0.03125, %v4642_v60  ;;  %v4647_v62 = vmul.f32 %v4645_v59, %v4645_v59 }
0x27ed   :  { %v4646_v63 = vsub.f32 %v4636_v9, %v4644_v61  ;;  %v4649_v0 = vsel %vm95_vm0, %v4647_v62, 0.0 }
0x27ee   :  { %4650 = vadd.xlane.f32.xlu0 %v4649_v0 }
0x27ef   :  { %v4648_v20 = vmul.f32 %v4646_v63, %v4646_v63 }
0x27f1   :  { %v4652_v1 = vsel %vm95_vm0, %v4648_v20, 0.0 }
0x27f2   :  { %4653 = vadd.xlane.f32.xlu1 %v4652_v1 }
0x2877   :  { %v4651_v3 = vpop.xlane.xlu0 %4650 }
0x2878   :  { %v4655_v4 = vmul.f32 0.03125, %v4651_v3 }
0x287a   :  { %v4657_v7 = vadd.f32 1e-05, %v4655_v4 }
0x287b   :  { %v4654_v41 = vpop.xlane.xlu1 %4653 }
0x287c   :  { %5373 = vrsqrt.f32 %v4657_v7  ;;  %v4656_v10 = vmul.f32 0.03125, %v4654_v41 }
0x287e   :  { %v4658_v12 = vadd.f32 1e-05, %v4656_v10 }
0x2880   :  { %5375 = vrsqrt.f32 %v4658_v12 }
0x2889   :  { %v5374_v5 = vpop.eup %5373 }
0x288a   :  { %v4661_v14 = vmul.f32 %v5374_v5, %v4645_v59 }
0x288c   :  { %v4669_v17 = vmul.f32 %v4816_v13, %v4661_v14 }
0x288d   :  { %v5376_v19 = vpop.eup %5375 }
0x288e   :  { %v4662_v51 = vmul.f32 %v5376_v19, %v4646_v63  ;;  %v4677_v21 = vadd.f32 %v4817_v15, %v4669_v17 }
0x2890   :  { %v4670_v18 = vmul.f32 %v4816_v13, %v4662_v51  ;;  %4679 = vst.msk [vmem:[#allocation5] sm:$0xff] %vm95_vm0, %v4677_v21 }
0x2892   :  { %v4678_v23 = vadd.f32 %v4817_v15, %v4670_v18 }
0x2894   :  { %4680 = vst.msk [vmem:[#allocation5 + $0x8] sm:$0xff] %vm95_vm0, %v4678_v23 }
0x2895   :  { %5408 = shalt.err (!%p5405_p9)
}
0x2896   :  { %s6138_s11 = smov 8   ;;  %s6139_s12 = smov 128  }
0x2897   :  { %4692 = dma.vmem_to_hbm [thread:$0]  %s4687_s1, 256, %s6132_s13, [#allocation4], %s6139_s12, %s6139_s12, %s6138_s11  }
0x2898   :  { %5419 = dma.done.wait [#allocation4], 256  }
0x2899   :  { %5420 = vsyncadd [#allocation4], 4294967040 }
0x289a   :  { %4696 = vsyncpa [#allocation3], 1 }
0x289b   :  { %4697 = vsyncpa [#allocation4], 1 }

</bundles_post_ra>
